<compile_context>
chip_gen: v5e
topology: v5e:2x2
jax: 0.10.0
libtpu: 0.0.40
codegen_flags: <defaults>
</compile_context>

<pallas_src>
import functools

import jax
import jax.numpy as jnp
from jax.experimental import pallas as pl
from jax.experimental.pallas import tpu as pltpu


# ----------------------------- kernel ---------------------------------------


def _layernorm1d(x, gamma, beta, eps):
    """LayerNorm1d with torch.var's default unbiased (C-1) variance."""
    c = x.shape[-1]
    mean = jnp.mean(x, axis=-1, keepdims=True)
    diff = x - mean
    var = jnp.sum(diff * diff, axis=-1, keepdims=True) * (1.0 / (c - 1))
    return gamma * (diff * jax.lax.rsqrt(var + eps)) + beta


def minigpt_kernel(
    x_ref,
    wqkv_ref, projw_ref, projb_ref,
    ln1g_ref, ln1b_ref, ln2g_ref, ln2b_ref,
    ff1w_ref, ff1b_ref, ff2w_ref, ff2b_ref,
    lnfg_ref, lnfb_ref, lmw_ref, lmb_ref,
    o_ref,
    x_sc,
    *, n_heads, head_size, eps,
):
    """One (batch element, layer) grid step of the MiniGPT forward.

    Grid = (batch, layer).  The activation for the current batch element is
    carried in the VMEM scratch `x_sc` across the (inner, "arbitrary") layer
    axis; layer weights stream in via their BlockSpec index_map.  The final
    LayerNorm + lm_head run (and the output is written) only on the last layer.
    """
    f32, bf16 = jnp.float32, jnp.bfloat16
    layer = pl.program_id(1)
    n_layers = pl.num_programs(1)
    _, T, C = x_ref.shape
    H, hs = n_heads, head_size
    scale = float(head_size) ** -0.5

    # Layer 0: load this batch element's embeddings into the carried scratch.
    @pl.when(layer == 0)
    def _init():
        x_sc[...] = x_ref[0]

    x = x_sc[...]                                        # (T, C) f32

    # ---- LayerNorm 1 + QKV projection (heads batched in one dot_general) ----
    xn = _layernorm1d(x, ln1g_ref[0], ln1b_ref[0], eps)          # f32
    xn_h = jnp.broadcast_to(xn.astype(bf16)[None], (H, T, C))    # head batch dim
    # wqkv_ref[0]: (H, C, 3*hs), per-head columns laid out [q | k | v].
    qkv = jnp.einsum('htc,hcd->htd', xn_h, wqkv_ref[0],
                     preferred_element_type=f32)                 # (H, T, 3*hs)
    q = qkv[:, :, 0 * hs:1 * hs].astype(bf16)                    # (H, T, hs)
    k = qkv[:, :, 1 * hs:2 * hs].astype(bf16)
    v = qkv[:, :, 2 * hs:3 * hs].astype(bf16)

    # ---- causal attention: scores (H, Tq, Tk), mask generated in-kernel ----
    s = jnp.einsum('hqd,hkd->hqk', q, k, preferred_element_type=f32)
    qq = jax.lax.broadcasted_iota(jnp.int32, (T, T), 0)          # query index
    kk = jax.lax.broadcasted_iota(jnp.int32, (T, T), 1)          # key index
    s = jnp.where(qq >= kk, s, -jnp.inf)    # masked_fill(tril == 0, -inf)
    s = s * scale                           # module order: mask, THEN scale

    # F.softmax(wei, dim=1): softmax over the QUERY axis (axis=1 here).
    # Exact divide (no approx reciprocal) for closer F.softmax parity.
    m = jnp.max(s, axis=1, keepdims=True)
    e = jnp.exp(s - m)
    p = e / jnp.sum(e, axis=1, keepdims=True)
    # attention dropout(p=0.2) -> identity in eval mode

    attn = jnp.einsum('hqk,hkd->hqd', p.astype(bf16), v,
                      preferred_element_type=f32)                # (H, T, hs)

    # Output projection: torch.cat over heads + Linear(C, C) is expressed as a
    # head-batched matmul against the per-head rows of W_proj, summed over h.
    proj = jnp.einsum('hqd,hdo->hqo', attn.astype(bf16), projw_ref[0],
                      preferred_element_type=f32)                # (H, T, C)
    x = x + (jnp.sum(proj, axis=0) + projb_ref[0])   # residual 1 (+ id dropout)

    # ---- LayerNorm 2 + FeedForward ----
    xn2 = _layernorm1d(x, ln2g_ref[0], ln2b_ref[0], eps)
    h1 = jnp.dot(xn2.astype(bf16), ff1w_ref[0],
                 preferred_element_type=f32) + ff1b_ref[0]
    h1 = jnp.maximum(h1, 0.0)                                    # ReLU
    ff = jnp.dot(h1.astype(bf16), ff2w_ref[0],
                 preferred_element_type=f32) + ff2b_ref[0]
    x = x + ff                                        # residual 2 (+ id dropout)

    x_sc[...] = x                                     # carry to next layer

    # ---- final LayerNorm + lm_head (lane-dense padded vocab) ----
    @pl.when(layer == n_layers - 1)
    def _finalize():
        xf = _layernorm1d(x, lnfg_ref[...], lnfb_ref[...], eps)
        o_ref[0] = (jnp.dot(xf.astype(bf16), lmw_ref[...],
                            preferred_element_type=f32) + lmb_ref[...])


# ----------------------------- wrappers -------------------------------------


def prepare_weights(params, *, n_heads, head_size, vocab_pad):
    """Stack per-layer weights along a leading L axis (streamed by the layer
    grid axis), fuse per-head q/k/v into one (H, C, 3*hs) tensor, cast matmul
    weights to bf16, and pad the lm_head to a lane-dense vocab width."""
    bf16 = jnp.bfloat16
    blocks = params["blocks"]

    def fuse_qkv(p):
        # each of wq/wk/wv: (H, C, hs) -> (H, C, 3*hs), per-head [q | k | v]
        return jnp.concatenate([p["wq"], p["wk"], p["wv"]], axis=-1)

    stk = lambda key: jnp.stack([p[key] for p in blocks])
    vocab = params["lm_w"].shape[-1]
    pad = vocab_pad - vocab
    return {
        "wqkv":   jnp.stack([fuse_qkv(p) for p in blocks]).astype(bf16),  # (L,H,C,3hs)
        "proj_w": stk("proj_w").astype(bf16),                             # (L,H,hs,C)
        "proj_b": stk("proj_b"),                                          # (L,1,C) f32
        "ln1_g": stk("ln1_g"), "ln1_b": stk("ln1_b"),
        "ln2_g": stk("ln2_g"), "ln2_b": stk("ln2_b"),
        "ff1_w": stk("ff1_w").astype(bf16), "ff1_b": stk("ff1_b"),
        "ff2_w": stk("ff2_w").astype(bf16), "ff2_b": stk("ff2_b"),
        "lnf_g": params["lnf_g"], "lnf_b": params["lnf_b"],
        "lm_w": jnp.pad(params["lm_w"], ((0, 0), (0, pad))).astype(bf16),
        "lm_b": jnp.pad(params["lm_b"], ((0, 0), (0, pad))),
    }


def minigpt_forward(idx, params, *, n_heads, head_size, eps=1e-5):
    """idx: (B, T) int32 token ids. Returns (logits, loss=None)."""
    B, T = idx.shape
    C = n_heads * head_size
    hid = 4 * C
    hs, H = head_size, n_heads
    n_layers = len(params["blocks"])
    vocab = params["lm_w"].shape[-1]
    vocab_pad = ((vocab + 127) // 128) * 128          # lane-dense lm_head output

    # Embedding lookups are gather glue -> plain JAX outside the kernel.
    tok = params["tok_emb"][idx]                      # (B, T, C)
    pos = params["pos_emb"][jnp.arange(T)]            # (T, C)
    x = (tok + pos[None, :, :]).astype(jnp.float32)   # (B, T, C)

    w = prepare_weights(params, n_heads=n_heads, head_size=head_size,
                        vocab_pad=vocab_pad)

    # Per-layer (stacked) weights: stream layer `l`'s slice (double-buffered).
    def lw(shape):
        return pl.BlockSpec((1,) + shape, lambda b, l: (l,) + (0,) * len(shape))

    # Global (non-stacked) weights: constant block index -> fetched once.
    def gw(shape):
        return pl.BlockSpec(shape, lambda b, l: (0,) * len(shape))

    in_specs = [
        pl.BlockSpec((1, T, C), lambda b, l: (b, 0, 0)),    # embeddings
        lw((H, C, 3 * hs)),                                 # wqkv
        lw((H, hs, C)),                                     # proj_w
        lw((1, C)),                                         # proj_b
        lw((1, C)), lw((1, C)),                             # ln1 gamma/beta
        lw((1, C)), lw((1, C)),                             # ln2 gamma/beta
        lw((C, hid)), lw((1, hid)),                         # ff1 w/b
        lw((hid, C)), lw((1, C)),                           # ff2 w/b
        gw((1, C)), gw((1, C)),                             # final LN gamma/beta
        gw((C, vocab_pad)), gw((1, vocab_pad)),             # lm_head w/b
    ]
    out_specs = pl.BlockSpec((1, T, vocab_pad), lambda b, l: (b, 0, 0))

    kernel = functools.partial(minigpt_kernel, n_heads=n_heads,
                               head_size=head_size, eps=eps)

    logits_pad = pl.pallas_call(
        kernel,
        out_shape=jax.ShapeDtypeStruct((B, T, vocab_pad), jnp.float32),
        grid_spec=pltpu.PrefetchScalarGridSpec(
            num_scalar_prefetch=0,
            grid=(B, n_layers),              # batch (parallel), layer (arbitrary)
            in_specs=in_specs,
            out_specs=out_specs,
            scratch_shapes=[pltpu.VMEM((T, C), jnp.float32)],  # carried activation
        ),
        compiler_params=pltpu.CompilerParams(
            dimension_semantics=("parallel", "arbitrary"),
            # Explicit scoped-VMEM budget: well above the v5e 16 MiB default,
            # still inside v7x's 64 MiB physical VMEM.
            vmem_limit_bytes=64 * 1024 * 1024),
    )(x, w["wqkv"], w["proj_w"], w["proj_b"],
      w["ln1_g"], w["ln1_b"], w["ln2_g"], w["ln2_b"],
      w["ff1_w"], w["ff1_b"], w["ff2_w"], w["ff2_b"],
      w["lnf_g"], w["lnf_b"], w["lm_w"], w["lm_b"])

    logits = logits_pad[:, :, :vocab]                 # un-pad the vocab axis
    # TODO(synk): training-mode cross-entropy loss path (target is not None)
    # is not implemented; forward returns (logits, None) as in eval usage.
    return logits, None


# ----------------------------- param init -----------------------------------


def init_params(key, *, vocab_size, n_emb, head_size, n_heads, context_len,
                n_layers):
    """Deterministic init mirroring MiniGPT._init_weights:
    Linear/Embedding weights ~ N(0, 0.02), biases zero, LN gamma=1 beta=0.
    Linear weights are stored pre-transposed as (in, out)."""
    assert head_size * n_heads == n_emb, "lm_head/proj require hs*nh == n_emb"
    hid = 4 * n_emb

    def normal(k, shape):
        return (0.02 * jax.random.normal(k, shape)).astype(jnp.float32)

    keys = jax.random.split(key, 3 + n_layers)
    params = {
        "tok_emb": normal(keys[0], (vocab_size, n_emb)),
        "pos_emb": normal(keys[1], (context_len, n_emb)),
        "lnf_g": jnp.ones((1, n_emb), jnp.float32),
        "lnf_b": jnp.zeros((1, n_emb), jnp.float32),
        "lm_w": normal(keys[2], (head_size * n_heads, vocab_size)),
        "lm_b": jnp.zeros((1, vocab_size), jnp.float32),
        "blocks": [],
    }
    for l in range(n_layers):
        lk = jax.random.split(keys[3 + l], 6)
        params["blocks"].append({
            "ln1_g": jnp.ones((1, n_emb), jnp.float32),
            "ln1_b": jnp.zeros((1, n_emb), jnp.float32),
            "wq": normal(lk[0], (n_heads, n_emb, head_size)),
            "wk": normal(lk[1], (n_heads, n_emb, head_size)),
            "wv": normal(lk[2], (n_heads, n_emb, head_size)),
            "proj_w": normal(lk[3], (n_heads, head_size, n_emb)),
            "proj_b": jnp.zeros((1, n_emb), jnp.float32),
            "ln2_g": jnp.ones((1, n_emb), jnp.float32),
            "ln2_b": jnp.zeros((1, n_emb), jnp.float32),
            "ff1_w": normal(lk[4], (n_emb, hid)),
            "ff1_b": jnp.zeros((1, hid), jnp.float32),
            "ff2_w": normal(lk[5], (hid, n_emb)),
            "ff2_b": jnp.zeros((1, n_emb), jnp.float32),
        })
    return params


# ----------------------------- main ------------------------------------------


if __name__ == "__main__":
    vocab_size = 32
    n_emb = 32             # NOTE: production sizes should be multiples of 128
    n_heads = 4
    head_size = 8          # head_size * n_heads == n_emb (required by lm_head)
    context_len = 8
    n_layers = 2
    B, T = 2, 8

    key = jax.random.PRNGKey(0)
    pkey, ikey = jax.random.split(key)
    params = init_params(pkey, vocab_size=vocab_size, n_emb=n_emb,
                         head_size=head_size, n_heads=n_heads,
                         context_len=context_len, n_layers=n_layers)

    idx = jax.random.randint(ikey, (B, T), 0, vocab_size, dtype=jnp.int32)

    logits, loss = minigpt_forward(idx, params, n_heads=n_heads,
                                   head_size=head_size)
    logits = jax.block_until_ready(logits)
    assert logits.shape == (B, T, vocab_size)
    assert bool(jnp.all(jnp.isfinite(logits)))
    print("KERNEL_OK")
</pallas_src>

<mosaic_0001>
module attributes {stable_mosaic.version = 11 : i64} {
  func.func @minigpt_kernel(%arg0: i32, %arg1: i32, %arg2: memref<1x8x32xf32, #tpu.memory_space<vmem>>, %arg3: memref<1x4x32x24xbf16, #tpu.memory_space<vmem>>, %arg4: memref<1x4x8x32xbf16, #tpu.memory_space<vmem>>, %arg5: memref<1x1x32xf32, #tpu.memory_space<vmem>>, %arg6: memref<1x1x32xf32, #tpu.memory_space<vmem>>, %arg7: memref<1x1x32xf32, #tpu.memory_space<vmem>>, %arg8: memref<1x1x32xf32, #tpu.memory_space<vmem>>, %arg9: memref<1x1x32xf32, #tpu.memory_space<vmem>>, %arg10: memref<1x32x128xbf16, #tpu.memory_space<vmem>>, %arg11: memref<1x1x128xf32, #tpu.memory_space<vmem>>, %arg12: memref<1x128x32xbf16, #tpu.memory_space<vmem>>, %arg13: memref<1x1x32xf32, #tpu.memory_space<vmem>>, %arg14: memref<1x32xf32, #tpu.memory_space<vmem>>, %arg15: memref<1x32xf32, #tpu.memory_space<vmem>>, %arg16: memref<32x128xbf16, #tpu.memory_space<vmem>>, %arg17: memref<1x128xf32, #tpu.memory_space<vmem>>, %arg18: memref<1x8x128xf32, #tpu.memory_space<vmem>>, %arg19: memref<8x32xf32, #tpu.memory_space<vmem>>) attributes {dimension_semantics = [#tpu.dimension_semantics<parallel>, #tpu.dimension_semantics<arbitrary>], iteration_bounds = array<i64: 2, 2>, scalar_prefetch = 0 : i64, scratch_operands = 1 : i64, tpu.core_type = #tpu.core_type<tc>, window_params = [{transform_indices = @transform_0, window_bounds = array<i64: 1, 8, 32>}, {transform_indices = @transform_1, window_bounds = array<i64: 1, 4, 32, 24>}, {transform_indices = @transform_2, window_bounds = array<i64: 1, 4, 8, 32>}, {transform_indices = @transform_3, window_bounds = array<i64: 1, 1, 32>}, {transform_indices = @transform_4, window_bounds = array<i64: 1, 1, 32>}, {transform_indices = @transform_5, window_bounds = array<i64: 1, 1, 32>}, {transform_indices = @transform_6, window_bounds = array<i64: 1, 1, 32>}, {transform_indices = @transform_7, window_bounds = array<i64: 1, 1, 32>}, {transform_indices = @transform_8, window_bounds = array<i64: 1, 32, 128>}, {transform_indices = @transform_9, window_bounds = array<i64: 1, 1, 128>}, {transform_indices = @transform_10, window_bounds = array<i64: 1, 128, 32>}, {transform_indices = @transform_11, window_bounds = array<i64: 1, 1, 32>}, {pipeline_mode = #tpu.pipeline_mode<synchronous>, transform_indices = @transform_12, window_bounds = array<i64: 1, 32>}, {pipeline_mode = #tpu.pipeline_mode<synchronous>, transform_indices = @transform_13, window_bounds = array<i64: 1, 32>}, {pipeline_mode = #tpu.pipeline_mode<synchronous>, transform_indices = @transform_14, window_bounds = array<i64: 32, 128>}, {pipeline_mode = #tpu.pipeline_mode<synchronous>, transform_indices = @transform_15, window_bounds = array<i64: 1, 128>}, {transform_indices = @transform_16, window_bounds = array<i64: 1, 8, 128>}]} {
    %c0_i32 = arith.constant 0 : i32
    %0 = arith.cmpi eq, %arg1, %c0_i32 : i32
    %1 = arith.extui %0 : i1 to i32
    %c0_i32_0 = arith.constant 0 : i32
    %2 = arith.cmpi ne, %1, %c0_i32_0 : i32
    scf.if %2 {
      %c0_61 = arith.constant 0 : index
      %c0_62 = arith.constant 0 : index
      %c0_63 = arith.constant 0 : index
      %119 = vector.load %arg2[%c0_61, %c0_62, %c0_63] : memref<1x8x32xf32, #tpu.memory_space<vmem>>, vector<1x8x32xf32>
      %120 = vector.shape_cast %119 : vector<1x8x32xf32> to vector<8x32xf32>
      %c0_64 = arith.constant 0 : index
      %c0_65 = arith.constant 0 : index
      %121 = vector.load %arg19[%c0_64, %c0_65] : memref<8x32xf32, #tpu.memory_space<vmem>>, vector<8x32xf32>
      tpu.vector_store %arg19[%c0_64, %c0_65], %120 {strides = array<i32>} : memref<8x32xf32, #tpu.memory_space<vmem>>, vector<8x32xf32>,
    } else {
    }
    %c0 = arith.constant 0 : index
    %c0_1 = arith.constant 0 : index
    %3 = vector.load %arg19[%c0, %c0_1] : memref<8x32xf32, #tpu.memory_space<vmem>>, vector<8x32xf32>
    %c0_2 = arith.constant 0 : index
    %c0_3 = arith.constant 0 : index
    %c0_4 = arith.constant 0 : index
    %4 = vector.load %arg6[%c0_2, %c0_3, %c0_4] : memref<1x1x32xf32, #tpu.memory_space<vmem>>, vector<1x1x32xf32>
    %5 = vector.shape_cast %4 : vector<1x1x32xf32> to vector<1x32xf32>
    %c0_5 = arith.constant 0 : index
    %c0_6 = arith.constant 0 : index
    %c0_7 = arith.constant 0 : index
    %6 = vector.load %arg7[%c0_5, %c0_6, %c0_7] : memref<1x1x32xf32, #tpu.memory_space<vmem>>, vector<1x1x32xf32>
    %7 = vector.shape_cast %6 : vector<1x1x32xf32> to vector<1x32xf32>
    %cst = arith.constant dense<0.000000e+00> : vector<8xf32>
    %8 = vector.multi_reduction <add>, %3, %cst [1] : vector<8x32xf32> to vector<8xf32>
    %9 = vector.shape_cast %8 : vector<8xf32> to vector<8x1xf32>
    %cst_8 = arith.constant 3.200000e+01 : f32
    %10 = vector.broadcast %cst_8 : f32 to vector<8x1xf32>
    %11 = arith.divf %9, %10 : vector<8x1xf32>
    %12 = vector.broadcast %11 : vector<8x1xf32> to vector<8x32xf32>
    %13 = arith.subf %3, %12 : vector<8x32xf32>
    %14 = arith.mulf %13, %13 : vector<8x32xf32>
    %cst_9 = arith.constant dense<0.000000e+00> : vector<8xf32>
    %15 = vector.multi_reduction <add>, %14, %cst_9 [1] : vector<8x32xf32> to vector<8xf32>
    %16 = vector.shape_cast %15 : vector<8xf32> to vector<8x1xf32>
    %cst_10 = arith.constant 0.0322580636 : f32
    %17 = vector.broadcast %cst_10 : f32 to vector<8x1xf32>
    %18 = arith.mulf %16, %17 : vector<8x1xf32>
    %cst_11 = arith.constant 9.99999974E-6 : f32
    %19 = vector.broadcast %cst_11 : f32 to vector<8x1xf32>
    %20 = arith.addf %18, %19 : vector<8x1xf32>
    %21 = math.rsqrt %20 : vector<8x1xf32>
    %22 = vector.broadcast %21 : vector<8x1xf32> to vector<8x32xf32>
    %23 = arith.mulf %13, %22 : vector<8x32xf32>
    %24 = vector.broadcast %5 : vector<1x32xf32> to vector<8x32xf32>
    %25 = arith.mulf %24, %23 : vector<8x32xf32>
    %26 = vector.broadcast %7 : vector<1x32xf32> to vector<8x32xf32>
    %27 = arith.addf %25, %26 : vector<8x32xf32>
    %28 = arith.truncf %27 : vector<8x32xf32> to vector<8x32xbf16>
    %29 = vector.shape_cast %28 : vector<8x32xbf16> to vector<1x8x32xbf16>
    %30 = vector.shape_cast %29 : vector<1x8x32xbf16> to vector<1x8x32xbf16>
    %31 = vector.broadcast %30 : vector<1x8x32xbf16> to vector<4x8x32xbf16>
    %c0_12 = arith.constant 0 : index
    %c0_13 = arith.constant 0 : index
    %c0_14 = arith.constant 0 : index
    %c0_15 = arith.constant 0 : index
    %32 = vector.load %arg3[%c0_12, %c0_13, %c0_14, %c0_15] : memref<1x4x32x24xbf16, #tpu.memory_space<vmem>>, vector<1x4x32x24xbf16>
    %33 = vector.shape_cast %32 : vector<1x4x32x24xbf16> to vector<4x32x24xbf16>
    "tpu.trace_start"() <{level = 10 : i32, message = "htc,hcd->htd"}> : () -> ()
    %cst_16 = arith.constant dense<0.000000e+00> : vector<4x8x24xf32>
    %34 = tpu.matmul %31, %33, %cst_16 {dimension_numbers = #tpu.dot_dimension_numbers<[2], [1], [1], [2], [0, 0, 0, 1, 1, 2], [0], [0]>} : vector<4x8x32xbf16>, vector<4x32x24xbf16>, vector<4x8x24xf32> -> vector<4x8x24xf32>
    "tpu.trace_stop"() : () -> ()
    %35 = vector.extract_strided_slice %34 {offsets = [0, 0, 0], sizes = [4, 8, 8], strides = [1, 1, 1]} : vector<4x8x24xf32> to vector<4x8x8xf32>
    %36 = arith.truncf %35 : vector<4x8x8xf32> to vector<4x8x8xbf16>
    %37 = vector.extract_strided_slice %34 {offsets = [0, 0, 8], sizes = [4, 8, 8], strides = [1, 1, 1]} : vector<4x8x24xf32> to vector<4x8x8xf32>
    %38 = arith.truncf %37 : vector<4x8x8xf32> to vector<4x8x8xbf16>
    %39 = vector.extract_strided_slice %34 {offsets = [0, 0, 16], sizes = [4, 8, 8], strides = [1, 1, 1]} : vector<4x8x24xf32> to vector<4x8x8xf32>
    %40 = arith.truncf %39 : vector<4x8x8xf32> to vector<4x8x8xbf16>
    "tpu.trace_start"() <{level = 10 : i32, message = "hqd,hkd->hqk"}> : () -> ()
    %cst_17 = arith.constant dense<0.000000e+00> : vector<4x8x8xf32>
    %41 = tpu.matmul %36, %38, %cst_17 {dimension_numbers = #tpu.dot_dimension_numbers<[2], [2], [1], [1], [0, 0, 0, 1, 1, 1], [0], [0]>} : vector<4x8x8xbf16>, vector<4x8x8xbf16>, vector<4x8x8xf32> -> vector<4x8x8xf32>
    "tpu.trace_stop"() : () -> ()
    %42 = tpu.iota {dimensions = array<i32: 0>} : vector<8x8xi32>
    %43 = tpu.iota {dimensions = array<i32: 1>} : vector<8x8xi32>
    %44 = arith.cmpi sge, %42, %43 : vector<8x8xi32>
    %cst_18 = arith.constant 0xFF800000 : f32
    %45 = vector.shape_cast %44 : vector<8x8xi1> to vector<1x8x8xi1>
    %46 = vector.broadcast %45 : vector<1x8x8xi1> to vector<4x8x8xi1>
    %47 = vector.broadcast %cst_18 : f32 to vector<4x8x8xf32>
    %48 = arith.select %46, %41, %47 : vector<4x8x8xi1>, vector<4x8x8xf32>
    %cst_19 = arith.constant 0.353553385 : f32
    %49 = vector.broadcast %cst_19 : f32 to vector<4x8x8xf32>
    %50 = arith.mulf %48, %49 : vector<4x8x8xf32>
    %cst_20 = arith.constant dense<0xFF800000> : vector<4x8xf32>
    %51 = vector.multi_reduction <maximumf>, %50, %cst_20 [1] : vector<4x8x8xf32> to vector<4x8xf32>
    %52 = vector.shape_cast %51 : vector<4x8xf32> to vector<4x1x8xf32>
    %53 = vector.broadcast %52 : vector<4x1x8xf32> to vector<4x8x8xf32>
    %54 = arith.subf %50, %53 : vector<4x8x8xf32>
    %55 = math.exp %54 : vector<4x8x8xf32>
    %cst_21 = arith.constant dense<0.000000e+00> : vector<4x8xf32>
    %56 = vector.multi_reduction <add>, %55, %cst_21 [1] : vector<4x8x8xf32> to vector<4x8xf32>
    %57 = vector.shape_cast %56 : vector<4x8xf32> to vector<4x1x8xf32>
    %58 = vector.broadcast %57 : vector<4x1x8xf32> to vector<4x8x8xf32>
    %59 = arith.divf %55, %58 : vector<4x8x8xf32>
    %60 = arith.truncf %59 : vector<4x8x8xf32> to vector<4x8x8xbf16>
    "tpu.trace_start"() <{level = 10 : i32, message = "hqk,hkd->hqd"}> : () -> ()
    %cst_22 = arith.constant dense<0.000000e+00> : vector<4x8x8xf32>
    %61 = tpu.matmul %60, %40, %cst_22 {dimension_numbers = #tpu.dot_dimension_numbers<[2], [1], [1], [2], [0, 0, 0, 1, 1, 2], [0], [0]>} : vector<4x8x8xbf16>, vector<4x8x8xbf16>, vector<4x8x8xf32> -> vector<4x8x8xf32>
    "tpu.trace_stop"() : () -> ()
    %62 = arith.truncf %61 : vector<4x8x8xf32> to vector<4x8x8xbf16>
    %c0_23 = arith.constant 0 : index
    %c0_24 = arith.constant 0 : index
    %c0_25 = arith.constant 0 : index
    %c0_26 = arith.constant 0 : index
    %63 = vector.load %arg4[%c0_23, %c0_24, %c0_25, %c0_26] : memref<1x4x8x32xbf16, #tpu.memory_space<vmem>>, vector<1x4x8x32xbf16>
    %64 = vector.shape_cast %63 : vector<1x4x8x32xbf16> to vector<4x8x32xbf16>
    "tpu.trace_start"() <{level = 10 : i32, message = "hqd,hdo->hqo"}> : () -> ()
    %cst_27 = arith.constant dense<0.000000e+00> : vector<4x8x32xf32>
    %65 = tpu.matmul %62, %64, %cst_27 {dimension_numbers = #tpu.dot_dimension_numbers<[2], [1], [1], [2], [0, 0, 0, 1, 1, 2], [0], [0]>} : vector<4x8x8xbf16>, vector<4x8x32xbf16>, vector<4x8x32xf32> -> vector<4x8x32xf32>
    "tpu.trace_stop"() : () -> ()
    %cst_28 = arith.constant dense<0.000000e+00> : vector<8x32xf32>
    %66 = vector.multi_reduction <add>, %65, %cst_28 [0] : vector<4x8x32xf32> to vector<8x32xf32>
    %c0_29 = arith.constant 0 : index
    %c0_30 = arith.constant 0 : index
    %c0_31 = arith.constant 0 : index
    %67 = vector.load %arg5[%c0_29, %c0_30, %c0_31] : memref<1x1x32xf32, #tpu.memory_space<vmem>>, vector<1x1x32xf32>
    %68 = vector.shape_cast %67 : vector<1x1x32xf32> to vector<1x32xf32>
    %69 = vector.broadcast %68 : vector<1x32xf32> to vector<8x32xf32>
    %70 = arith.addf %66, %69 : vector<8x32xf32>
    %71 = arith.addf %3, %70 : vector<8x32xf32>
    %c0_32 = arith.constant 0 : index
    %c0_33 = arith.constant 0 : index
    %c0_34 = arith.constant 0 : index
    %72 = vector.load %arg8[%c0_32, %c0_33, %c0_34] : memref<1x1x32xf32, #tpu.memory_space<vmem>>, vector<1x1x32xf32>
    %73 = vector.shape_cast %72 : vector<1x1x32xf32> to vector<1x32xf32>
    %c0_35 = arith.constant 0 : index
    %c0_36 = arith.constant 0 : index
    %c0_37 = arith.constant 0 : index
    %74 = vector.load %arg9[%c0_35, %c0_36, %c0_37] : memref<1x1x32xf32, #tpu.memory_space<vmem>>, vector<1x1x32xf32>
    %75 = vector.shape_cast %74 : vector<1x1x32xf32> to vector<1x32xf32>
    %cst_38 = arith.constant dense<0.000000e+00> : vector<8xf32>
    %76 = vector.multi_reduction <add>, %71, %cst_38 [1] : vector<8x32xf32> to vector<8xf32>
    %77 = vector.shape_cast %76 : vector<8xf32> to vector<8x1xf32>
    %cst_39 = arith.constant 3.200000e+01 : f32
    %78 = vector.broadcast %cst_39 : f32 to vector<8x1xf32>
    %79 = arith.divf %77, %78 : vector<8x1xf32>
    %80 = vector.broadcast %79 : vector<8x1xf32> to vector<8x32xf32>
    %81 = arith.subf %71, %80 : vector<8x32xf32>
    %82 = arith.mulf %81, %81 : vector<8x32xf32>
    %cst_40 = arith.constant dense<0.000000e+00> : vector<8xf32>
    %83 = vector.multi_reduction <add>, %82, %cst_40 [1] : vector<8x32xf32> to vector<8xf32>
    %84 = vector.shape_cast %83 : vector<8xf32> to vector<8x1xf32>
    %cst_41 = arith.constant 0.0322580636 : f32
    %85 = vector.broadcast %cst_41 : f32 to vector<8x1xf32>
    %86 = arith.mulf %84, %85 : vector<8x1xf32>
    %cst_42 = arith.constant 9.99999974E-6 : f32
    %87 = vector.broadcast %cst_42 : f32 to vector<8x1xf32>
    %88 = arith.addf %86, %87 : vector<8x1xf32>
    %89 = math.rsqrt %88 : vector<8x1xf32>
    %90 = vector.broadcast %89 : vector<8x1xf32> to vector<8x32xf32>
    %91 = arith.mulf %81, %90 : vector<8x32xf32>
    %92 = vector.broadcast %73 : vector<1x32xf32> to vector<8x32xf32>
    %93 = arith.mulf %92, %91 : vector<8x32xf32>
    %94 = vector.broadcast %75 : vector<1x32xf32> to vector<8x32xf32>
    %95 = arith.addf %93, %94 : vector<8x32xf32>
    %96 = arith.truncf %95 : vector<8x32xf32> to vector<8x32xbf16>
    %c0_43 = arith.constant 0 : index
    %c0_44 = arith.constant 0 : index
    %c0_45 = arith.constant 0 : index
    %97 = vector.load %arg10[%c0_43, %c0_44, %c0_45] : memref<1x32x128xbf16, #tpu.memory_space<vmem>>, vector<1x32x128xbf16>
    %98 = vector.shape_cast %97 : vector<1x32x128xbf16> to vector<32x128xbf16>
    %cst_46 = arith.constant dense<0.000000e+00> : vector<8x128xf32>
    %99 = tpu.matmul %96, %98, %cst_46 {dimension_numbers = #tpu.dot_dimension_numbers<[1], [0], [0], [1], [0, 0, 1, 1], [], []>} : vector<8x32xbf16>, vector<32x128xbf16>, vector<8x128xf32> -> vector<8x128xf32>
    %c0_47 = arith.constant 0 : index
    %c0_48 = arith.constant 0 : index
    %c0_49 = arith.constant 0 : index
    %100 = vector.load %arg11[%c0_47, %c0_48, %c0_49] : memref<1x1x128xf32, #tpu.memory_space<vmem>>, vector<1x1x128xf32>
    %101 = vector.shape_cast %100 : vector<1x1x128xf32> to vector<1x128xf32>
    %102 = vector.broadcast %101 : vector<1x128xf32> to vector<8x128xf32>
    %103 = arith.addf %99, %102 : vector<8x128xf32>
    %cst_50 = arith.constant 0.000000e+00 : f32
    %104 = vector.broadcast %cst_50 : f32 to vector<8x128xf32>
    %105 = arith.maximumf %103, %104 : vector<8x128xf32>
    %106 = arith.truncf %105 : vector<8x128xf32> to vector<8x128xbf16>
    %c0_51 = arith.constant 0 : index
    %c0_52 = arith.constant 0 : index
    %c0_53 = arith.constant 0 : index
    %107 = vector.load %arg12[%c0_51, %c0_52, %c0_53] : memref<1x128x32xbf16, #tpu.memory_space<vmem>>, vector<1x128x32xbf16>
    %108 = vector.shape_cast %107 : vector<1x128x32xbf16> to vector<128x32xbf16>
    %cst_54 = arith.constant dense<0.000000e+00> : vector<8x32xf32>
    %109 = tpu.matmul %106, %108, %cst_54 {dimension_numbers = #tpu.dot_dimension_numbers<[1], [0], [0], [1], [0, 0, 1, 1], [], []>} : vector<8x128xbf16>, vector<128x32xbf16>, vector<8x32xf32> -> vector<8x32xf32>
    %c0_55 = arith.constant 0 : index
    %c0_56 = arith.constant 0 : index
    %c0_57 = arith.constant 0 : index
    %110 = vector.load %arg13[%c0_55, %c0_56, %c0_57] : memref<1x1x32xf32, #tpu.memory_space<vmem>>, vector<1x1x32xf32>
    %111 = vector.shape_cast %110 : vector<1x1x32xf32> to vector<1x32xf32>
    %112 = vector.broadcast %111 : vector<1x32xf32> to vector<8x32xf32>
    %113 = arith.addf %109, %112 : vector<8x32xf32>
    %114 = arith.addf %71, %113 : vector<8x32xf32>
    %c0_58 = arith.constant 0 : index
    %c0_59 = arith.constant 0 : index
    %115 = vector.load %arg19[%c0_58, %c0_59] : memref<8x32xf32, #tpu.memory_space<vmem>>, vector<8x32xf32>
    tpu.vector_store %arg19[%c0_58, %c0_59], %114 {strides = array<i32>} : memref<8x32xf32, #tpu.memory_space<vmem>>, vector<8x32xf32>,
    %c1_i32 = arith.constant 1 : i32
    %116 = arith.cmpi eq, %arg1, %c1_i32 : i32
    %117 = arith.extui %116 : i1 to i32
    %c0_i32_60 = arith.constant 0 : i32
    %118 = arith.cmpi ne, %117, %c0_i32_60 : i32
    scf.if %118 {
      %c0_61 = arith.constant 0 : index
      %c0_62 = arith.constant 0 : index
      %119 = vector.load %arg14[%c0_61, %c0_62] : memref<1x32xf32, #tpu.memory_space<vmem>>, vector<1x32xf32>
      %c0_63 = arith.constant 0 : index
      %c0_64 = arith.constant 0 : index
      %120 = vector.load %arg15[%c0_63, %c0_64] : memref<1x32xf32, #tpu.memory_space<vmem>>, vector<1x32xf32>
      %cst_65 = arith.constant dense<0.000000e+00> : vector<8xf32>
      %121 = vector.multi_reduction <add>, %114, %cst_65 [1] : vector<8x32xf32> to vector<8xf32>
      %122 = vector.shape_cast %121 : vector<8xf32> to vector<8x1xf32>
      %cst_66 = arith.constant 3.200000e+01 : f32
      %123 = vector.broadcast %cst_66 : f32 to vector<8x1xf32>
      %124 = arith.divf %122, %123 : vector<8x1xf32>
      %125 = vector.broadcast %124 : vector<8x1xf32> to vector<8x32xf32>
      %126 = arith.subf %114, %125 : vector<8x32xf32>
      %127 = arith.mulf %126, %126 : vector<8x32xf32>
      %cst_67 = arith.constant dense<0.000000e+00> : vector<8xf32>
      %128 = vector.multi_reduction <add>, %127, %cst_67 [1] : vector<8x32xf32> to vector<8xf32>
      %129 = vector.shape_cast %128 : vector<8xf32> to vector<8x1xf32>
      %cst_68 = arith.constant 0.0322580636 : f32
      %130 = vector.broadcast %cst_68 : f32 to vector<8x1xf32>
      %131 = arith.mulf %129, %130 : vector<8x1xf32>
      %cst_69 = arith.constant 9.99999974E-6 : f32
      %132 = vector.broadcast %cst_69 : f32 to vector<8x1xf32>
      %133 = arith.addf %131, %132 : vector<8x1xf32>
      %134 = math.rsqrt %133 : vector<8x1xf32>
      %135 = vector.broadcast %134 : vector<8x1xf32> to vector<8x32xf32>
      %136 = arith.mulf %126, %135 : vector<8x32xf32>
      %137 = vector.broadcast %119 : vector<1x32xf32> to vector<8x32xf32>
      %138 = arith.mulf %137, %136 : vector<8x32xf32>
      %139 = vector.broadcast %120 : vector<1x32xf32> to vector<8x32xf32>
      %140 = arith.addf %138, %139 : vector<8x32xf32>
      %141 = arith.truncf %140 : vector<8x32xf32> to vector<8x32xbf16>
      %c0_70 = arith.constant 0 : index
      %c0_71 = arith.constant 0 : index
      %142 = vector.load %arg16[%c0_70, %c0_71] : memref<32x128xbf16, #tpu.memory_space<vmem>>, vector<32x128xbf16>
      %cst_72 = arith.constant dense<0.000000e+00> : vector<8x128xf32>
      %143 = tpu.matmul %141, %142, %cst_72 {dimension_numbers = #tpu.dot_dimension_numbers<[1], [0], [0], [1], [0, 0, 1, 1], [], []>} : vector<8x32xbf16>, vector<32x128xbf16>, vector<8x128xf32> -> vector<8x128xf32>
      %c0_73 = arith.constant 0 : index
      %c0_74 = arith.constant 0 : index
      %144 = vector.load %arg17[%c0_73, %c0_74] : memref<1x128xf32, #tpu.memory_space<vmem>>, vector<1x128xf32>
      %145 = vector.broadcast %144 : vector<1x128xf32> to vector<8x128xf32>
      %146 = arith.addf %143, %145 : vector<8x128xf32>
      %c0_75 = arith.constant 0 : index
      %c0_76 = arith.constant 0 : index
      %c0_77 = arith.constant 0 : index
      %147 = vector.load %arg18[%c0_75, %c0_76, %c0_77] : memref<1x8x128xf32, #tpu.memory_space<vmem>>, vector<1x8x128xf32>
      %148 = vector.shape_cast %147 : vector<1x8x128xf32> to vector<8x128xf32>
      %149 = vector.shape_cast %146 : vector<8x128xf32> to vector<1x8x128xf32>
      tpu.vector_store %arg18[%c0_75, %c0_76, %c0_77], %149 {strides = array<i32>} : memref<1x8x128xf32, #tpu.memory_space<vmem>>, vector<1x8x128xf32>,
    } else {
    }
    return
  }
  func.func @transform_0(%arg0: i32, %arg1: i32) -> (i32, i32, i32) {
    %c0_i32 = arith.constant 0 : i32
    %c0_i32_0 = arith.constant 0 : i32
    %c0_i32_1 = arith.constant 0 : i32
    return %arg0, %c0_i32, %c0_i32_0 : i32, i32, i32
  }
  func.func @transform_1(%arg0: i32, %arg1: i32) -> (i32, i32, i32, i32) {
    %c0_i32 = arith.constant 0 : i32
    %c0_i32_0 = arith.constant 0 : i32
    %c0_i32_1 = arith.constant 0 : i32
    %c0_i32_2 = arith.constant 0 : i32
    return %arg1, %c0_i32, %c0_i32_0, %c0_i32_1 : i32, i32, i32, i32
  }
  func.func @transform_2(%arg0: i32, %arg1: i32) -> (i32, i32, i32, i32) {
    %c0_i32 = arith.constant 0 : i32
    %c0_i32_0 = arith.constant 0 : i32
    %c0_i32_1 = arith.constant 0 : i32
    %c0_i32_2 = arith.constant 0 : i32
    return %arg1, %c0_i32, %c0_i32_0, %c0_i32_1 : i32, i32, i32, i32
  }
  func.func @transform_3(%arg0: i32, %arg1: i32) -> (i32, i32, i32) {
    %c0_i32 = arith.constant 0 : i32
    %c0_i32_0 = arith.constant 0 : i32
    %c0_i32_1 = arith.constant 0 : i32
    return %arg1, %c0_i32, %c0_i32_0 : i32, i32, i32
  }
  func.func @transform_4(%arg0: i32, %arg1: i32) -> (i32, i32, i32) {
    %c0_i32 = arith.constant 0 : i32
    %c0_i32_0 = arith.constant 0 : i32
    %c0_i32_1 = arith.constant 0 : i32
    return %arg1, %c0_i32, %c0_i32_0 : i32, i32, i32
  }
  func.func @transform_5(%arg0: i32, %arg1: i32) -> (i32, i32, i32) {
    %c0_i32 = arith.constant 0 : i32
    %c0_i32_0 = arith.constant 0 : i32
    %c0_i32_1 = arith.constant 0 : i32
    return %arg1, %c0_i32, %c0_i32_0 : i32, i32, i32
  }
  func.func @transform_6(%arg0: i32, %arg1: i32) -> (i32, i32, i32) {
    %c0_i32 = arith.constant 0 : i32
    %c0_i32_0 = arith.constant 0 : i32
    %c0_i32_1 = arith.constant 0 : i32
    return %arg1, %c0_i32, %c0_i32_0 : i32, i32, i32
  }
  func.func @transform_7(%arg0: i32, %arg1: i32) -> (i32, i32, i32) {
    %c0_i32 = arith.constant 0 : i32
    %c0_i32_0 = arith.constant 0 : i32
    %c0_i32_1 = arith.constant 0 : i32
    return %arg1, %c0_i32, %c0_i32_0 : i32, i32, i32
  }
  func.func @transform_8(%arg0: i32, %arg1: i32) -> (i32, i32, i32) {
    %c0_i32 = arith.constant 0 : i32
    %c0_i32_0 = arith.constant 0 : i32
    %c0_i32_1 = arith.constant 0 : i32
    return %arg1, %c0_i32, %c0_i32_0 : i32, i32, i32
  }
  func.func @transform_9(%arg0: i32, %arg1: i32) -> (i32, i32, i32) {
    %c0_i32 = arith.constant 0 : i32
    %c0_i32_0 = arith.constant 0 : i32
    %c0_i32_1 = arith.constant 0 : i32
    return %arg1, %c0_i32, %c0_i32_0 : i32, i32, i32
  }
  func.func @transform_10(%arg0: i32, %arg1: i32) -> (i32, i32, i32) {
    %c0_i32 = arith.constant 0 : i32
    %c0_i32_0 = arith.constant 0 : i32
    %c0_i32_1 = arith.constant 0 : i32
    return %arg1, %c0_i32, %c0_i32_0 : i32, i32, i32
  }
  func.func @transform_11(%arg0: i32, %arg1: i32) -> (i32, i32, i32) {
    %c0_i32 = arith.constant 0 : i32
    %c0_i32_0 = arith.constant 0 : i32
    %c0_i32_1 = arith.constant 0 : i32
    return %arg1, %c0_i32, %c0_i32_0 : i32, i32, i32
  }
  func.func @transform_12(%arg0: i32, %arg1: i32) -> (i32, i32) {
    %c0_i32 = arith.constant 0 : i32
    %c0_i32_0 = arith.constant 0 : i32
    %c0_i32_1 = arith.constant 0 : i32
    return %c0_i32, %c0_i32_0 : i32, i32
  }
  func.func @transform_13(%arg0: i32, %arg1: i32) -> (i32, i32) {
    %c0_i32 = arith.constant 0 : i32
    %c0_i32_0 = arith.constant 0 : i32
    %c0_i32_1 = arith.constant 0 : i32
    return %c0_i32, %c0_i32_0 : i32, i32
  }
  func.func @transform_14(%arg0: i32, %arg1: i32) -> (i32, i32) {
    %c0_i32 = arith.constant 0 : i32
    %c0_i32_0 = arith.constant 0 : i32
    %c0_i32_1 = arith.constant 0 : i32
    return %c0_i32, %c0_i32_0 : i32, i32
  }
  func.func @transform_15(%arg0: i32, %arg1: i32) -> (i32, i32) {
    %c0_i32 = arith.constant 0 : i32
    %c0_i32_0 = arith.constant 0 : i32
    %c0_i32_1 = arith.constant 0 : i32
    return %c0_i32, %c0_i32_0 : i32, i32
  }
  func.func @transform_16(%arg0: i32, %arg1: i32) -> (i32, i32, i32) {
    %c0_i32 = arith.constant 0 : i32
    %c0_i32_0 = arith.constant 0 : i32
    %c0_i32_1 = arith.constant 0 : i32
    return %arg0, %c0_i32, %c0_i32_0 : i32, i32, i32
  }
}

</mosaic_0001>

<bundles_post_ra>
// kernel: tpu_custom_call.1
= control target key start
LH: loop header
LB: loop body
LE: loop exit
PB: predicated region body
PF: predicated region fallthrough
CT: control target
= control target key end

     0   :  { %s2499_s0 = inlined_call_operand.vmem [shape: f32[2,8,32], index: 0, kind: input, shape index: {}]   ;;  %s2500_s1 = inlined_call_operand.vmem [shape: bf16[2,4,32,24], index: 1, kind: input, shape index: {}]   ;;  %s2501_s2 = inlined_call_operand.vmem [shape: bf16[2,4,8,32], index: 2, kind: input, shape index: {}]   ;;  %s2502_s3 = inlined_call_operand.vmem [shape: f32[2,1,32], index: 3, kind: input, shape index: {}]   ;;  %s2503_s4 = inlined_call_operand.vmem [shape: f32[2,1,32], index: 4, kind: input, shape index: {}]   ;;  %s2504_s5 = inlined_call_operand.vmem [shape: f32[2,1,32], index: 5, kind: input, shape index: {}]   ;;  %s2505_s6 = inlined_call_operand.vmem [shape: f32[2,1,32], index: 6, kind: input, shape index: {}]   ;;  %s2506_s7 = inlined_call_operand.vmem [shape: f32[2,1,32], index: 7, kind: input, shape index: {}]   ;;  %s2507_s8 = inlined_call_operand.vmem [shape: bf16[2,32,128], index: 8, kind: input, shape index: {}]   ;;  %s2508_s9 = inlined_call_operand.vmem [shape: f32[2,1,128], index: 9, kind: input, shape index: {}]   ;;  %s2509_s10 = inlined_call_operand.vmem [shape: bf16[2,128,32], index: 10, kind: input, shape index: {}]   ;;  %s2510_s11 = inlined_call_operand.vmem [shape: f32[2,1,32], index: 11, kind: input, shape index: {}]   ;;  %s2511_s12 = inlined_call_operand.vmem [shape: f32[1,32], index: 12, kind: input, shape index: {}]   ;;  %s2512_s13 = inlined_call_operand.vmem [shape: f32[1,32], index: 13, kind: input, shape index: {}]   ;;  %s2513_s14 = inlined_call_operand.vmem [shape: bf16[32,128], index: 14, kind: input, shape index: {}]   ;;  %s2514_s15 = inlined_call_operand.vmem [shape: f32[1,128], index: 15, kind: input, shape index: {}]   ;;  %s2515_s16 = inlined_call_operand.hbm [shape: f32[2,8,128], index: 16, kind: output, shape index: {}]  }
   0x1   :  { %2534 = sst [smem:[#allocation21_spill]] %s2499_s0 }
   0x2   :  { %2535 = sst [smem:[#allocation22_spill]] %s2500_s1 }
   0x3   :  { %2536 = sst [smem:[#allocation23_spill]] %s2501_s2 }
   0x4   :  { %2537 = sst [smem:[#allocation24_spill]] %s2511_s12 }
   0x5   :  { %2538 = sst [smem:[#allocation25_spill]] %s2512_s13 }
   0x6   :  { %2539 = sst [smem:[#allocation26_spill]] %s2513_s14 }
   0x7   :  { %2540 = sst [smem:[#allocation27_spill]] %s2514_s15 }
   0x8   :  { %2541 = sst [smem:[#allocation28_spill]] %s2515_s16 }
   0x9   :  { %21 = vsyncpa [#allocation4], 0 }
   0xa   :  { %23 = vsyncpa [#allocation4 + $0x1], 0  ;;  %s2166_s21 = smov 0   ;;  %s2168_s22 = smov 0  }
   0xb   :  { %s2170_s23 = smov 0   ;;  %s2172_s24 = smov 0  }
   0xc   :  { %s2174_s25 = smov 0   ;;  %s2176_s26 = smov 0  }
   0xd   :  { %s2178_s27 = smov 0   ;;  %s2180_s28 = smov 0  }
   0xe LB: > { %2542 = sst [smem:[#allocation6_spill]] %s2048_s21  ;;  %s1731_s29 = sadd.s32 4294967295, %s2076_s28   ;;  %s2076_s28 = sphi %s2180_s28, %s29_s28   ;;  %s2072_s27 = sphi %s2178_s27, %s2588_s27   ;;  %s2068_s26 = sphi %s2176_s26, %s2587_s26   ;;  %s2064_s25 = sphi %s2174_s25, %s2586_s25   ;;  %s2060_s24 = sphi %s2172_s24, %s2585_s24   ;;  %s2056_s23 = sphi %s2170_s23, %s2584_s23   ;;  %s2052_s22 = sphi %s2168_s22, %s2583_s22   ;;  %s2048_s21 = sphi %s2166_s21, %s2582_s21  }
   0xf   : > { %2543 = sst [smem:[#allocation7_spill]] %s2052_s22  ;;  %s1732_s30 = sadd.s32 4294967294, %s2076_s28  }
  0x10   : > { %2544 = sst [smem:[#allocation8_spill]] %s2056_s23  ;;  %s38_s0 = sadd.s32 1, %s2068_s26 }
  0x11   : > { %2545 = sst [smem:[#allocation9_spill]] %s2060_s24  ;;  %p39_p0 = scmp.ge.s32.totalorder %s38_s0, 2 }
  0x12   : > { %2546 = sst [smem:[#allocation10_spill]] %s2064_s25  ;;  %s41_s17 = sadd.s32 1, %s2072_s27 }
  0x13   : > { %2547 = sst [smem:[#allocation11_spill]] %s2068_s26  ;;  %p454_p1 = scmp.ne.s32.totalorder %s2056_s23, %s2052_s22 }
  0x14   : > { %2548 = sst [smem:[#allocation12_spill]] %s2072_s27  ;;  %p455_p2 = scmp.eq.s32.totalorder %s1731_s29, 3 }
  0x15   : > { %2549 = sst [smem:[#allocation13_spill]] %s2076_s28  ;;  %s2590_s0 = smov (%p39_p0, %s38_s0), 0 }
  0x16   : > { %2550 = sst [smem:[#allocation14_spill]] %s2590_s0  ;;  %s2592_s17 = smov (!%p39_p0, %s41_s17), %s2072_s27 }
  0x17   : > { %p2215_p3 = por %p455_p2, %p454_p1  ;;  %p460_p4 = scmp.ne.s32.totalorder %s2052_s22, %s2048_s21 }
  0x18   : > { %p43_p5 = scmp.ge.s32.totalorder %s2592_s17, 2  ;;  %p461_p6 = scmp.eq.s32.totalorder %s1732_s30, 3 }
  0x19   : > { %s2551_s18 = scalar_select %p2215_p3, 1, 0 }
  0x1a   : > { %p1735_p7 = scmp.ge.s32.totalorder %s2076_s28, 1  ;;  %p572_p8 = scmp.lt.s32.totalorder %s2076_s28, 5 }
  0x1b   : > { %2552 = sst [smem:[#allocation15_spill]] %s2551_s18  ;;  %s2594_s17 = smov (%p43_p5, %s2592_s17), 0 }
  0x1c   : > { %2553 = sst [smem:[#allocation16_spill]] %s2594_s17  ;;  %p2225_p9 = por %p461_p6, %p460_p4 }
  0x1d   : > { %p573_p10 = pnand %p1735_p7, %p572_p8  ;;  %s441_s20 = ssub.s32 %s2072_s27, %s2594_s17 }
  0x1e   : > { %s2554_s19 = scalar_select %p2225_p9, 1, 0 }
  0x1f   : > { %s444_s29 = sadd.s32 1, %s2056_s23  ;;  %p442_p11 = scmp.eq.s32.totalorder %s441_s20, 0 }
  0x20   : > { %2555 = sst [smem:[#allocation17_spill]] %s2554_s19  ;;  %576 = sbr.rel (%p573_p10) target bundleno = 2051 (0x803), region = 84 }
  0x21   : > { %s2233_s0 = scalar_select %p442_p11, %s2056_s23, %s444_s29  }
  0x23   : > { %2556 = sst [smem:[#allocation18_spill]] %s2233_s0 }
  0x25   : > { %s2521_s30 = sand.u32 1, %s2052_s22   ;;  %p662_p12 = scmp.lt.s32.totalorder %s2064_s25, 1 }
  0x26   : > { %s2239_s26 = sshll.u32 %s2521_s30, 3  ;;  %p666_p13 = scmp.lt.s32.totalorder %s2060_s24, 1 }
  0x27   : > { %s663_s19 = scalar_select %p662_p12, %s2064_s25, 1 }
  0x28   : > { %s2244_s21 = scalar_select %p666_p13, %s2060_s24, 1 }
  0x29   : > { %s1737_s20 = sshll.u32 %s663_s19, 3  ;;  %s2557_s27 = sld [smem:[#allocation21_spill]] }
  0x2a   : > { %s1850_s0 = sshll.u32 %s2244_s21, 6  ;;  %s2558_s1 = sld [smem:[#allocation22_spill]] }
  0x2b   : > { %s1851_s18 = sshll.u32 %s2244_s21, 4  ;;  %s2560_s2 = sld [smem:[#allocation23_spill]] }
  0x2c   : > { %s684_s23 = scalar_lea.vmem %s2504_s5, %s2244_s21  ;;  %s690_s25 = scalar_lea.vmem %s2506_s7, %s2244_s21 }
  0x2d   : > { %s2284_s12 = scalar_lea.vmem %s2507_s8, %s1851_s18  ;;  %s698_s24 = scalar_lea.vmem %s2508_s9, %s2244_s21 }
  0x2e   : > { %s2562_s22 = sld [smem:[#allocation9_spill]] }
  0x2f   : > { %s665_s30 = scalar_lea.vmem %s2557_s27, %s1737_s20  ;;  %s681_s27 = scalar_lea.vmem %s2503_s4, %s2244_s21 }
  0x30   : > { %s2253_s16 = scalar_lea.vmem %s2558_s1, %s1850_s0  ;;  %s2293_s20 = scalar_lea.vmem %s2509_s10, %s1850_s0 }
  0x31   : > { %2559 = sst [smem:[#allocation19_spill]] %s2253_s16  ;;  %s2259_s15 = scalar_lea.vmem %s2560_s2, %s1851_s18 }
  0x32   : > { %2561 = sst [smem:[#allocation20_spill]] %s2259_s15  ;;  %s706_s1 = scalar_lea.vmem %s2510_s11, %s2244_s21 }
  0x33   : > { %s661_s16 = scalar_lea.vmem [#allocation3], %s2239_s26 }
  0x34   : > { %p1746_p0 = scmp.ne.s32.totalorder %s2562_s22, 0 }
  0x36   : > { %711 = sbr.rel (%p1746_p0) target bundleno = 61 (0x3d), region = 88 }
  0x3b   : > { %v712_v0 = vld [vmem:[%s665_s30] sm:$0xff]  ;;  %vm713_vm0 = vcmask 261120  }
  0x3c   : > { %714 = vst.msk [vmem:[#allocation2] sm:$0xff] %vm713_vm0, %v712_v0 }
  0x3d PF: > { %vm718_vm1 = vcmask 261120   ;;  %s2563_s2 = sld [smem:[#allocation19_spill]]  ;;  %v2078_v3 = vmov 32.0   ;;  %v1948_v32 = vld [vmem:[%s681_s27] ss:$0 sm:$0xff]  ;;  %s2079_s19 = smov 120  }
  0x3e   : > { %1955 = vrcp.f32 %v2078_v3  ;;  %v1949_v35 = vld [vmem:[%s684_s23] ss:$0 sm:$0xff]  ;;  %s2080_s27 = smov 112   ;;  %vm885_vm6 = vcmask 64512   ;;  %vm1129_vm7 = vcmask 1043456   ;;  %s2564_s23 = sld [smem:[#allocation20_spill]] }
  0x3f   : > { %s2565_s17 = scalar_lea.vmem %s2502_s3, %s2244_s21  ;;  %s2566_s29 = scalar_lea.vmem %s2505_s6, %s2244_s21 }
  0x43   : > { %v2301_v1 = vld [vmem:[#allocation2] sm:$0xff]  ;;  %v1855_v15 = vld [vmem:[%s2563_s2 + $0x8] sm:$0xff]  ;;  %v1857_v16 = vld [vmem:[%s2563_s2 + $0x18] sm:$0xff] }
  0x44   : > { %v719_v2 = vsel %vm718_vm1, %v2301_v1, 0.0  ;;  %v1956_v4 = vpop.eup %1955  ;;  %v1861_v17 = vld [vmem:[%s2563_s2 + $0x38] sm:$0xff]  ;;  %794 = vmatpush.bf16.msra.mxu0 %v1855_v15  ;;  %819 = vmatpush.bf16.msra.mxu2 %v1857_v16  ;;  %v1854_v18 = vld [vmem:[%s2563_s2] sm:$0xff]  ;;  %v1856_v19 = vld [vmem:[%s2563_s2 + $0x10] sm:$0xff] }
  0x45   : > { %720 = vadd.xlane.f32.xlu0 %v719_v2  ;;  %v723_v5 = vmul.f32 32.0, %v1956_v4  ;;  %vm727_vm2 = vweird.f32 %v1956_v4  ;;  %869 = vmatpush.bf16.msra.mxu3 %v1861_v17  ;;  %v1860_v20 = vld [vmem:[%s2563_s2 + $0x30] sm:$0xff]  ;;  %v1859_v22 = vld [vmem:[%s2563_s2 + $0x28] sm:$0xff]  ;;  %v1858_v24 = vld [vmem:[%s2563_s2 + $0x20] sm:$0xff] }
  0x47   : > { %v724_v6 = vsub.f32 1.0, %v723_v5 }
  0x48   : > { %795 = vmatpush.bf16.msra.mxu0 %v1854_v18  ;;  %820 = vmatpush.bf16.msra.mxu2 %v1856_v19 }
  0x49   : > { %v725_v7 = vmul.f32 %v1956_v4, %v724_v6  ;;  %870 = vmatpush.bf16.msra.mxu3 %v1860_v20 }
  0x4b   : > { %v726_v8 = vadd.f32 %v1956_v4, %v725_v7 }
  0x4c   : > { %844 = vmatpush.bf16.msrb.mxu2 %v1859_v22 }
  0x4d   : > { %v2305_v9 = vsel %vm727_vm2, %v1956_v4, %v726_v8 }
  0x50   : > { %845 = vmatpush.bf16.msrb.mxu2 %v1858_v24 }
  0xb8   : > { %v721_v10 = vpop.xlane.xlu0 %720 }
  0xb9   : > { %v729_v11 = vmul.f32 %v2305_v9, %v721_v10 }
  0xbb   : > { %v730_v12 = vsub.f32 %v2301_v1, %v729_v11 }
  0xbd   : > { %v731_v13 = vmul.f32 %v730_v12, %v730_v12 }
  0xbf   : > { %v732_v14 = vsel %vm718_vm1, %v731_v13, 0.0  ;;  %v977_v13 = vlaneseq }
  0xc0   : > { %733 = vadd.xlane.f32.xlu0 %v732_v14 }
  0xc1   : > { %v2344_v14 = vshrl.u32 %v977_v13, 7  ;;  %v2346_v15 = vand.u32 127, %v977_v13 }
  0xc3   : > { %vm981_vm8 = vcmp.ge.s32.totalorder %v2344_v14, %v2346_v15 }
 0x133   : > { %v734_v21 = vpop.xlane.xlu0 %733 }
 0x134   : > { %v735_v23 = vmul.f32 0.032258064, %v734_v21 }
 0x136   : > { %v736_v25 = vadd.f32 1e-05, %v735_v23 }
 0x138   : > { %1957 = vrsqrt.f32 %v736_v25  ;;  %vm743_vm4 = vweird.f32 %v736_v25 }
 0x13e   : > { %v1958_v26 = vpop.eup %1957 }
 0x13f   : > { %v738_v27 = vmul.f32 %v1958_v26, %v736_v25  ;;  %vm744_vm3 = vweird.f32 %v1958_v26 }
 0x140   : > { %vm745_vm5 = vmor %vm743_vm4, %vm744_vm3 }
 0x141   : > { %v739_v28 = vmul.f32 %v1958_v26, %v738_v27 }
 0x143   : > { %v740_v29 = vmul.f32 0.5, %v739_v28 }
 0x145   : > { %v741_v30 = vsub.f32 1.5, %v740_v29 }
 0x147   : > { %v742_v31 = vmul.f32 %v1958_v26, %v741_v30 }
 0x149   : > { %v746_v33 = vsel %vm745_vm5, %v1958_v26, %v742_v31 }
 0x14a   : > { %v747_v34 = vmul.f32 %v746_v33, %v730_v12 }
 0x14c   : > { %v751_v36 = vmul.f32 %v1948_v32, %v747_v34 }
 0x14e   : > { %v755_v37 = vadd.f32 %v1949_v35, %v751_v36 }
 0x150   : > { %v756_v38 = vpack.c.bf16 %v755_v37, %v755_v37 }
 0x152   : > { %1755 = vmatmul.msk.bf16.vlgmr.msra.gmra.mxu0 %vm718_vm1, %v756_v38  ;;  %1764 = vmatmul.msk.bf16.vlgmr.msra.gmra.mxu2 %vm718_vm1, %v756_v38 }
 0x153   : > { %1782 = vmatmul.msk.bf16.vlgmr.msra.gmra.mxu3 %vm718_vm1, %v756_v38 }
 0x162   : > { %1773 = vmatmul.msk.bf16.vlgmr.msrb.gmra.mxu2 %vm718_vm1, %v756_v38 }
 0x1cf   : > { %v797_v39 = vpop.f32.mrf.mxu0 }
 0x1d0   : > { %v876_v40 = vpack.c.bf16 %v797_v39, %v797_v39 }
 0x1d2   : > { %v881_v41 = vunpack.c.l.b16 %v876_v40 }
 0x1d4   : > { %v882_v42 = vpack.c.b16 %v881_v41, %v881_v41 }
 0x1d5   : > { %v822_v43 = vpop.f32.mrf.mxu2 }
 0x1d6   : > { %v877_v44 = vpack.c.bf16 %v822_v43, %v822_v43  ;;  %v872_v45 = vpop.f32.mrf.mxu3  ;;  %883 = vrot.lane.b32.xlu2 %v882_v42, %s2079_s19 }
 0x1d7   : > { %v799_v46 = vpop.f32.mrf.mxu0  ;;  %v879_v54 = vpack.c.bf16 %v872_v45, %v872_v45 }
 0x1d8   : > { %v906_v47 = vunpack.c.l.b16 %v877_v44 }
 0x1d9   : > { %v954_v57 = vunpack.c.l.b16 %v879_v54 }
 0x1da   : > { %v907_v48 = vpack.c.b16 %v906_v47, %v906_v47 }
 0x1db   : > { %v955_v58 = vpack.c.b16 %v954_v57, %v954_v57 }
 0x1dd   : > { %v824_v49 = vpop.f32.mrf.mxu2 }
 0x1de   : > { %v874_v50 = vpop.f32.mrf.mxu3  ;;  %908 = vrot.lane.b32.xlu2 %v907_v48, %s2079_s19 }
 0x1e5   : > { %v847_v51 = vpop.f32.mrf.mxu2 }
 0x1e6   : > { %v878_v52 = vpack.c.bf16 %v847_v51, %v847_v51  ;;  %1124 = vrot.lane.b32.xlu2 %v882_v42, %s2080_s27 }
 0x1e8   : > { %v930_v53 = vunpack.c.l.b16 %v878_v52 }
 0x1ea   : > { %v931_v55 = vpack.c.b16 %v930_v53, %v930_v53 }
 0x1ec   : > { %1167 = vrot.lane.b32.xlu0 %v931_v55, %s2080_s27  ;;  %932 = vrot.lane.b32.xlu1 %v931_v55, %s2079_s19 }
 0x1ed   : > { %v849_v56 = vpop.f32.mrf.mxu2 }
 0x1f4   : > { %956 = vrot.lane.b32.xlu1 %v955_v58, %s2079_s19 }
 0x1fc   : > { %1188 = vrot.lane.b32.xlu1 %v955_v58, %s2080_s27 }
 0x204   : > { %1146 = vrot.lane.b32.xlu1 %v907_v48, %s2080_s27 }
 0x230   : > { %v884_v59 = vpop.permute.xlu2 %883 }
 0x231   : > { %v890_v60 = vsel %vm885_vm6, %v884_v59, 0 }
 0x232   : > { %899 = vmatpush.bf16.xpose.msrb.mxu0 %v890_v60 }
 0x238   : > { %v909_v61 = vpop.permute.xlu2 %908 }
 0x239   : > { %1783 = vmatmul.msk.bf16.vlgmr.msrb.gmra.mxu0 %vm885_vm6, %v876_v40  ;;  %v914_v62 = vsel %vm885_vm6, %v909_v61, 0 }
 0x23a   : > { %923 = vmatpush.bf16.xpose.msra.mxu1 %v914_v62 }
 0x240   : > { %v1125_v63 = vpop.permute.xlu2 %1124 }
 0x241   : > { %v1131_v0 = vsel %vm1129_vm7, %v1125_v63, 0  ;;  %1784 = vmatmul.msk.bf16.vlgmr.msra.gmra.mxu1 %vm885_vm6, %v877_v44 }
 0x242   : > { %1140 = vmatpush.bf16.msra.mxu0 %v1131_v0 }
 0x25e   : > { %v1168_v2 = vpop.permute.xlu0 %1167  ;;  %v933_v3 = vpop.permute.xlu1 %932 }
 0x25f   : > { %v1173_v4 = vsel %vm1129_vm7, %v1168_v2, 0  ;;  %v938_v5 = vsel %vm885_vm6, %v933_v3, 0 }
 0x260   : > { %947 = vmatpush.bf16.xpose.msra.mxu2 %v938_v5 }
 0x266   : > { %v957_v6 = vpop.permute.xlu1 %956 }
 0x267   : > { %1785 = vmatmul.msk.bf16.vlgmr.msra.gmra.mxu2 %vm885_vm6, %v878_v52  ;;  %v962_v7 = vsel %vm885_vm6, %v957_v6, 0 }
 0x268   : > { %1182 = vmatpush.bf16.msrb.mxu2 %v1173_v4  ;;  %971 = vmatpush.bf16.xpose.msrb.mxu3 %v962_v7 }
 0x26e   : > { %v1189_v8 = vpop.permute.xlu1 %1188 }
 0x26f   : > { %v1194_v10 = vsel %vm1129_vm7, %v1189_v8, 0  ;;  %1786 = vmatmul.msk.bf16.vlgmr.msrb.gmra.mxu3 %vm885_vm6, %v879_v54 }
 0x270   : > { %1203 = vmatpush.bf16.msra.mxu3 %v1194_v10 }
 0x276   : > { %v1147_v11 = vpop.permute.xlu1 %1146 }
 0x277   : > { %v1152_v12 = vsel %vm1129_vm7, %v1147_v11, 0 }
 0x278   : > { %1161 = vmatpush.bf16.msrb.mxu1 %v1152_v12 }
 0x2b6   : > { %v901_v16 = vpop.f32.mrf.mxu0 }
 0x2b7   : > { %v984_v17 = vsel %vm981_vm8, %v901_v16, -inf }
 0x2b8   : > { %v988_v18 = vmul.f32 0.35355338, %v984_v17 }
 0x2ba   : > { %v992_v19 = vsel %vm885_vm6, %v988_v18, -inf }
 0x2bb   : > { %v993_v20 = vrot.slane %v992_v19, 4 }
 0x2bd   : > { %v994_v21 = vmax.f32 %v992_v19, %v993_v20 }
 0x2be   : > { %v903_v22 = vpop.f32.mrf.mxu0  ;;  %v925_v23 = vpop.f32.mrf.mxu1 }
 0x2bf   : > { %v995_v24 = vrot.slane %v994_v21, 2  ;;  %v985_v25 = vsel %vm981_vm8, %v925_v23, -inf }
 0x2c0   : > { %v989_v26 = vmul.f32 0.35355338, %v985_v25 }
 0x2c1   : > { %v996_v27 = vmax.f32 %v994_v21, %v995_v24 }
 0x2c2   : > { %v999_v28 = vsel %vm885_vm6, %v989_v26, -inf }
 0x2c3   : > { %v997_v29 = vrot.slane %v996_v27, 1  ;;  %v1000_v30 = vrot.slane %v999_v28, 4 }
 0x2c5   : > { %v998_v31 = vmax.f32 %v996_v27, %v997_v29  ;;  %v1001_v32 = vmax.f32 %v999_v28, %v1000_v30 }
 0x2c6   : > { %v927_v33 = vpop.f32.mrf.mxu1 }
 0x2c7   : > { %v1020_v34 = vsub.f32 %v988_v18, %v998_v31  ;;  %v1002_v35 = vrot.slane %v1001_v32, 2 }
 0x2c9   : > { %v1024_v36 = vmul.f32 1.442695, %v1020_v34  ;;  %v1003_v37 = vmax.f32 %v1001_v32, %v1002_v35 }
 0x2cb   : > { %1959 = vpow2.f32 %v1024_v36  ;;  %v1004_v38 = vrot.slane %v1003_v37, 1 }
 0x2cd   : > { %v1005_v39 = vmax.f32 %v1003_v37, %v1004_v38 }
 0x2cf   : > { %v1021_v40 = vsub.f32 %v989_v26, %v1005_v39 }
 0x2d1   : > { %v1960_v41 = vpop.eup %1959  ;;  %v1026_v42 = vmul.f32 1.442695, %v1021_v40 }
 0x2d2   : > { %v1032_v43 = vsel %vm885_vm6, %v1960_v41, 0.0 }
 0x2d3   : > { %v1033_v44 = vrot.slane %v1032_v43, 4  ;;  %1961 = vpow2.f32 %v1026_v42 }
 0x2d5   : > { %v1034_v45 = vadd.f32 %v1033_v44, %v1032_v43 }
 0x2d7   : > { %v1035_v46 = vrot.slane %v1034_v45, 2 }
 0x2d9   : > { %v1962_v47 = vpop.eup %1961  ;;  %v1036_v48 = vadd.f32 %v1035_v46, %v1034_v45 }
 0x2da   : > { %v1039_v49 = vsel %vm885_vm6, %v1962_v47, 0.0 }
 0x2db   : > { %v1037_v50 = vrot.slane %v1036_v48, 1  ;;  %v1040_v51 = vrot.slane %v1039_v49, 4 }
 0x2dd   : > { %v1038_v52 = vadd.f32 %v1037_v50, %v1036_v48  ;;  %v1041_v53 = vadd.f32 %v1040_v51, %v1039_v49 }
 0x2df   : > { %1963 = vrcp.f32 %v1038_v52  ;;  %v1042_v54 = vrot.slane %v1041_v53, 2  ;;  %v1071_v61 = vand.u32 2147483648, %v1038_v52  ;;  %v1069_v63 = vand.u32 2147483647, %v1038_v52 }
 0x2e0   : > { %vm1065_vm10 = vweird.f32 %v1038_v52 }
 0x2e1   : > { %v1043_v55 = vadd.f32 %v1042_v54, %v1041_v53  ;;  %v1072_v5 = vor.u32 1.1754944e-38, %v1071_v61  ;;  %vm1070_vm12 = vcmp.eq.f32.partialorder %v1069_v63, 8.507059e+37 }
 0x2e3   : > { %v1044_v56 = vrot.slane %v1043_v55, 1 }
 0x2e5   : > { %v1964_v57 = vpop.eup %1963  ;;  %v1045_v59 = vadd.f32 %v1044_v56, %v1043_v55 }
 0x2e6   : > { %v1061_v58 = vmul.f32 %v1964_v57, %v1038_v52  ;;  %vm1066_vm9 = vweird.f32 %v1964_v57 }
 0x2e7   : > { %1965 = vrcp.f32 %v1045_v59  ;;  %vm1067_vm11 = vmor %vm1065_vm10, %vm1066_vm9  ;;  %v1084_v21 = vand.u32 2147483647, %v1045_v59  ;;  %v1086_v22 = vand.u32 2147483648, %v1045_v59  ;;  %vm1080_vm14 = vweird.f32 %v1045_v59 }
 0x2e8   : > { %v1062_v60 = vsub.f32 1.0, %v1061_v58 }
 0x2e9   : > { %v1087_v30 = vor.u32 1.1754944e-38, %v1086_v22  ;;  %vm1085_vm0 = vcmp.eq.f32.partialorder %v1084_v21, 8.507059e+37 }
 0x2ea   : > { %v1063_v62 = vmul.f32 %v1964_v57, %v1062_v60  ;;  %v949_v0 = vpop.f32.mrf.mxu2 }
 0x2eb   : > { %v986_v2 = vsel %vm981_vm8, %v949_v0, -inf }
 0x2ec   : > { %v1064_v3 = vadd.f32 %v1964_v57, %v1063_v62  ;;  %v990_v4 = vmul.f32 0.35355338, %v986_v2 }
 0x2ed   : > { %v1966_v6 = vpop.eup %1965 }
 0x2ee   : > { %v1068_v7 = vsel %vm1067_vm11, %v1964_v57, %v1064_v3  ;;  %v1006_v8 = vsel %vm885_vm6, %v990_v4, -inf  ;;  %v1076_v12 = vmul.f32 %v1966_v6, %v1045_v59  ;;  %vm1081_vm13 = vweird.f32 %v1966_v6 }
 0x2ef   : > { %v1073_v10 = vsel %vm1070_vm12, %v1072_v5, %v1068_v7  ;;  %v1007_v11 = vrot.slane %v1006_v8, 4  ;;  %vm1082_vm15 = vmor %vm1080_vm14, %vm1081_vm13 }
 0x2f0   : > { %v1074_v13 = vmul.f32 %v1960_v41, %v1073_v10  ;;  %v1077_v17 = vsub.f32 1.0, %v1076_v12 }
 0x2f1   : > { %v1008_v16 = vmax.f32 %v1006_v8, %v1007_v11 }
 0x2f2   : > { %v1120_v18 = vpack.c.bf16 %v1074_v13, %v1074_v13  ;;  %v951_v19 = vpop.f32.mrf.mxu2  ;;  %v973_v20 = vpop.f32.mrf.mxu3  ;;  %v1078_v25 = vmul.f32 %v1966_v6, %v1077_v17 }
 0x2f3   : > { %v1009_v23 = vrot.slane %v1008_v16, 2  ;;  %v987_v24 = vsel %vm981_vm8, %v973_v20, -inf }
 0x2f4   : > { %v991_v26 = vmul.f32 0.35355338, %v987_v24  ;;  %1787 = vmatmul.msk.bf16.vlgmr.msra.gmra.mxu0 %vm885_vm6, %v1120_v18  ;;  %v1079_v28 = vadd.f32 %v1966_v6, %v1078_v25 }
 0x2f5   : > { %v1010_v27 = vmax.f32 %v1008_v16, %v1009_v23 }
 0x2f6   : > { %v1013_v29 = vsel %vm885_vm6, %v991_v26, -inf  ;;  %v1083_v33 = vsel %vm1082_vm15, %v1966_v6, %v1079_v28  ;;  %v1214_v28 = vld [vmem:[%s2564_s23 + $0x4] sm:$0xf] }
 0x2f7   : > { %v1011_v31 = vrot.slane %v1010_v27, 1  ;;  %v1014_v32 = vrot.slane %v1013_v29, 4  ;;  %v1088_v34 = vsel %vm1085_vm0, %v1087_v30, %v1083_v33 }
 0x2f8   : > { %v1089_v15 = vmul.f32 %v1962_v47, %v1088_v34 }
 0x2f9   : > { %v1012_v35 = vmax.f32 %v1010_v27, %v1011_v31  ;;  %v1015_v14 = vmax.f32 %v1013_v29, %v1014_v32  ;;  %v1240_v29 = vsel %vm1129_vm7, %v1214_v28, 0 }
 0x2fa   : > { %v975_v36 = vpop.f32.mrf.mxu3  ;;  %v1121_v39 = vpack.c.bf16 %v1089_v15, %v1089_v15  ;;  %1249 = vmatpush.bf16.msra.mxu1 %v1240_v29 }
 0x2fb   : > { %v1022_v37 = vsub.f32 %v990_v4, %v1012_v35  ;;  %v1016_v38 = vrot.slane %v1015_v14, 2  ;;  %v1216_v36 = vld [vmem:[%s2564_s23 + $0xc] sm:$0xf] }
 0x2fc   : > { %1788 = vmatmul.msk.bf16.vlgmr.msrb.gmra.mxu1 %vm885_vm6, %v1121_v39 }
 0x2fd   : > { %v1028_v40 = vmul.f32 1.442695, %v1022_v37  ;;  %v1017_v41 = vmax.f32 %v1015_v14, %v1016_v38  ;;  %v1215_v14 = vld [vmem:[%s2564_s23 + $0x8] sm:$0xf]  ;;  %v1278_v37 = vsel %vm1129_vm7, %v1216_v36, 0 }
 0x2fe   : > { %v1259_v15 = vsel %vm1129_vm7, %v1215_v14, 0  ;;  %1287 = vmatpush.bf16.msrb.mxu3 %v1278_v37  ;;  %v1954_v37 = vld [vmem:[%s706_s1] ss:$0 sm:$0xff] }
 0x2ff   : > { %1967 = vpow2.f32 %v1028_v40  ;;  %v1018_v42 = vrot.slane %v1017_v41, 1  ;;  %1268 = vmatpush.bf16.msra.mxu2 %v1259_v15 }
 0x301   : > { %v1019_v43 = vmax.f32 %v1017_v41, %v1018_v42 }
 0x303   : > { %v1023_v44 = vsub.f32 %v991_v26, %v1019_v43  ;;  %v1213_v26 = vld [vmem:[%s2564_s23] sm:$0xf] }
 0x304   : > { %v1221_v27 = vsel %vm1129_vm7, %v1213_v26, 0 }
 0x305   : > { %v1968_v45 = vpop.eup %1967  ;;  %v1030_v46 = vmul.f32 1.442695, %v1023_v44  ;;  %1230 = vmatpush.bf16.msrb.mxu0 %v1221_v27  ;;  %v1952_v27 = vld [vmem:[%s690_s25] ss:$0 sm:$0xff] }
 0x306   : > { %v1046_v48 = vsel %vm885_vm6, %v1968_v45, 0.0 }
 0x307   : > { %v1047_v49 = vrot.slane %v1046_v48, 4  ;;  %1969 = vpow2.f32 %v1030_v46 }
 0x309   : > { %v1048_v50 = vadd.f32 %v1047_v49, %v1046_v48 }
 0x30b   : > { %v1049_v47 = vrot.slane %v1048_v50, 2 }
 0x30d   : > { %v1970_v51 = vpop.eup %1969  ;;  %v1050_v52 = vadd.f32 %v1049_v47, %v1048_v50 }
 0x30e   : > { %v1053_v53 = vsel %vm885_vm6, %v1970_v51, 0.0 }
 0x30f   : > { %v1051_v54 = vrot.slane %v1050_v52, 1  ;;  %v1054_v55 = vrot.slane %v1053_v53, 4 }
 0x311   : > { %v1052_v56 = vadd.f32 %v1051_v54, %v1050_v52  ;;  %v1055_v57 = vadd.f32 %v1054_v55, %v1053_v53 }
 0x313   : > { %1971 = vrcp.f32 %v1052_v56  ;;  %v1056_v58 = vrot.slane %v1055_v57, 2  ;;  %v1101_v2 = vand.u32 2147483648, %v1052_v56  ;;  %v1099_v4 = vand.u32 2147483647, %v1052_v56 }
 0x314   : > { %vm1095_vm3 = vweird.f32 %v1052_v56 }
 0x315   : > { %v1057_v59 = vadd.f32 %v1056_v58, %v1055_v57  ;;  %v1102_v6 = vor.u32 1.1754944e-38, %v1101_v2  ;;  %vm1100_vm5 = vcmp.eq.f32.partialorder %v1099_v4, 8.507059e+37 }
 0x317   : > { %v1058_v60 = vrot.slane %v1057_v59, 1 }
 0x319   : > { %v1972_v61 = vpop.eup %1971  ;;  %v1059_v63 = vadd.f32 %v1058_v60, %v1057_v59 }
 0x31a   : > { %v1091_v62 = vmul.f32 %v1972_v61, %v1052_v56  ;;  %vm1096_vm2 = vweird.f32 %v1972_v61  ;;  %v1950_v56 = vld [vmem:[%s2565_s17] ss:$0 sm:$0xff] }
 0x31b   : > { %1973 = vrcp.f32 %v1059_v63  ;;  %vm1097_vm4 = vmor %vm1095_vm3, %vm1096_vm2  ;;  %v1116_v17 = vand.u32 2147483648, %v1059_v63  ;;  %v1114_v19 = vand.u32 2147483647, %v1059_v63  ;;  %vm1110_vm9 = vweird.f32 %v1059_v63 }
 0x31c   : > { %v1092_v0 = vsub.f32 1.0, %v1091_v62 }
 0x31d   : > { %v1117_v21 = vor.u32 1.1754944e-38, %v1116_v17  ;;  %vm1115_vm11 = vcmp.eq.f32.partialorder %v1114_v19, 8.507059e+37 }
 0x31e   : > { %v1093_v3 = vmul.f32 %v1972_v61, %v1092_v0 }
 0x320   : > { %v1094_v5 = vadd.f32 %v1972_v61, %v1093_v3 }
 0x321   : > { %v1974_v7 = vpop.eup %1973 }
 0x322   : > { %v1098_v8 = vsel %vm1097_vm4, %v1972_v61, %v1094_v5  ;;  %v1106_v11 = vmul.f32 %v1974_v7, %v1059_v63  ;;  %vm1111_vm8 = vweird.f32 %v1974_v7  ;;  %v1863_v5 = vld [vmem:[%s2284_s12 + $0x8] sm:$0xff] }
 0x323   : > { %v1103_v10 = vsel %vm1100_vm5, %v1102_v6, %v1098_v8  ;;  %vm1112_vm10 = vmor %vm1110_vm9, %vm1111_vm8  ;;  %1368 = vmatpush.bf16.msra.mxu0 %v1863_v5  ;;  %v1862_v6 = vld [vmem:[%s2284_s12] sm:$0xff] }
 0x324   : > { %v1104_v12 = vmul.f32 %v1968_v45, %v1103_v10  ;;  %v1107_v13 = vsub.f32 1.0, %v1106_v11  ;;  %v1870_v10 = vld [vmem:[%s2293_s20 + $0x30] sm:$0xff] }
 0x326   : > { %v1122_v16 = vpack.c.bf16 %v1104_v12, %v1104_v12  ;;  %v1108_v18 = vmul.f32 %v1974_v7, %v1107_v13  ;;  %v1869_v12 = vld [vmem:[%s2293_s20 + $0x28] sm:$0xff]  ;;  %v1868_v13 = vld [vmem:[%s2293_s20 + $0x20] sm:$0xff] }
 0x327   : > { %1369 = vmatpush.bf16.msra.mxu0 %v1862_v6 }
 0x328   : > { %1789 = vmatmul.msk.bf16.vlgmr.msrb.gmra.mxu2 %vm885_vm6, %v1122_v16  ;;  %v1109_v20 = vadd.f32 %v1974_v7, %v1108_v18  ;;  %v1867_v18 = vld [vmem:[%s2293_s20 + $0x18] sm:$0xff] }
 0x32a   : > { %v1113_v22 = vsel %vm1112_vm10, %v1974_v7, %v1109_v20 }
 0x32b   : > { %v1118_v23 = vsel %vm1115_vm11, %v1117_v21, %v1113_v22  ;;  %v1866_v21 = vld [vmem:[%s2293_s20 + $0x10] sm:$0xff] }
 0x32c   : > { %v1119_v24 = vmul.f32 %v1970_v51, %v1118_v23 }
 0x32e   : > { %v1123_v25 = vpack.c.bf16 %v1119_v24, %v1119_v24  ;;  %v1951_v24 = vld [vmem:[%s2566_s29] ss:$0 sm:$0xff] }
 0x330   : > { %1790 = vmatmul.msk.bf16.vlgmr.msra.gmra.mxu3 %vm885_vm6, %v1123_v25 }
 0x371   : > { %v1142_v30 = vpop.f32.mrf.mxu0 }
 0x372   : > { %v1209_v31 = vpack.c.bf16 %v1142_v30, %v1142_v30 }
 0x374   : > { %1791 = vmatmul.msk.bf16.vlgmr.msrb.gmra.mxu0 %vm885_vm6, %v1209_v31  ;;  %v1865_v31 = vld [vmem:[%s2293_s20 + $0x8] sm:$0xff] }
 0x379   : > { %v1144_v32 = vpop.f32.mrf.mxu0  ;;  %v1163_v33 = vpop.f32.mrf.mxu1 }
 0x37a   : > { %v1210_v34 = vpack.c.bf16 %v1163_v33, %v1163_v33  ;;  %v1864_v32 = vld [vmem:[%s2293_s20] sm:$0xff] }
 0x37b   : > { %v1953_v33 = vld [vmem:[%s698_s24] ss:$0 sm:$0xff] }
 0x37c   : > { %1792 = vmatmul.msk.bf16.vlgmr.msra.gmra.mxu1 %vm885_vm6, %v1210_v34 }
 0x381   : > { %v1165_v35 = vpop.f32.mrf.mxu1 }
 0x3ab   : > { %v1184_v38 = vpop.f32.mrf.mxu2 }
 0x3ac   : > { %v1211_v39 = vpack.c.bf16 %v1184_v38, %v1184_v38 }
 0x3ae   : > { %1793 = vmatmul.msk.bf16.vlgmr.msra.gmra.mxu2 %vm885_vm6, %v1211_v39 }
 0x3b3   : > { %v1186_v40 = vpop.f32.mrf.mxu2  ;;  %v1205_v41 = vpop.f32.mrf.mxu3 }
 0x3b4   : > { %v1212_v42 = vpack.c.bf16 %v1205_v41, %v1205_v41 }
 0x3b6   : > { %1794 = vmatmul.msk.bf16.vlgmr.msrb.gmra.mxu3 %vm885_vm6, %v1212_v42 }
 0x3bb   : > { %v1207_v43 = vpop.f32.mrf.mxu3 }
 0x3f1   : > { %v1232_v44 = vpop.f32.mrf.mxu0 }
 0x3f2   : > { %v1293_v47 = vsel %vm718_vm1, %v1232_v44, 0.0 }
 0x3f9   : > { %v1234_v45 = vpop.f32.mrf.mxu0  ;;  %v1251_v46 = vpop.f32.mrf.mxu1 }
 0x3fa   : > { %v1294_v50 = vsel %vm718_vm1, %v1251_v46, 0.0 }
 0x3fb   : > { %v1295_v52 = vadd.f32 %v1294_v50, %v1293_v47 }
 0x401   : > { %v1253_v48 = vpop.f32.mrf.mxu1 }
 0x431   : > { %v1270_v49 = vpop.f32.mrf.mxu2 }
 0x432   : > { %v1296_v51 = vsel %vm718_vm1, %v1270_v49, 0.0 }
 0x433   : > { %v1297_v54 = vadd.f32 %v1296_v51, %v1295_v52 }
 0x439   : > { %v1272_v53 = vpop.f32.mrf.mxu2  ;;  %v1289_v55 = vpop.f32.mrf.mxu3 }
 0x43a   : > { %v1298_v57 = vsel %vm718_vm1, %v1289_v55, 0.0 }
 0x43b   : > { %v1299_v58 = vadd.f32 %v1298_v57, %v1297_v54 }
 0x43d   : > { %v1304_v59 = vadd.f32 %v1950_v56, %v1299_v58 }
 0x43f   : > { %v1305_v60 = vadd.f32 %v1304_v59, %v2301_v1  ;;  %v1871_v1 = vld [vmem:[%s2293_s20 + $0x38] sm:$0xff]  ;;  %s2567_s20 = sld [smem:[#allocation9_spill]] }
 0x440   : > { %1445 = vmatpush.bf16.msrb.mxu1 %v1871_v1 }
 0x441   : > { %v1291_v61 = vpop.f32.mrf.mxu3  ;;  %v1308_v62 = vsel %vm718_vm1, %v1305_v60, 0.0 }
 0x442   : > { %1309 = vadd.xlane.f32.xlu2 %v1308_v62 }
 0x444   : > { %1446 = vmatpush.bf16.msrb.mxu1 %v1870_v10 }
 0x445   : > { %p1836_p1 = scmp.ne.s32.totalorder %s2567_s20, 1 }
 0x446   : > { %s2568_s24 = sld [smem:[#allocation26_spill]] (!%p1836_p1) }
 0x447   : > { %s2570_s14 = sld [smem:[#allocation24_spill]] (!%p1836_p1) }
 0x448   : > { %1447 = vmatpush.bf16.msrb.mxu1 %v1869_v12  ;;  %s2571_s28 = sld [smem:[#allocation25_spill]] (!%p1836_p1) }
 0x449   : > { %s2572_s2 = sld [smem:[#allocation27_spill]] (!%p1836_p1) }
 0x44c   : > { %1448 = vmatpush.bf16.msrb.mxu1 %v1868_v13  ;;  %s2569_s30 = smov (!%p1836_p1), %s2568_s24 }
 0x450   : > { %1449 = vmatpush.bf16.msrb.mxu1 %v1867_v18 }
 0x454   : > { %1450 = vmatpush.bf16.msrb.mxu1 %v1866_v21 }
 0x458   : > { %1451 = vmatpush.bf16.msrb.mxu1 %v1865_v31 }
 0x45c   : > { %1452 = vmatpush.bf16.msrb.mxu1 %v1864_v32 }
 0x4b5   : > { %v1310_v63 = vpop.xlane.xlu2 %1309 }
 0x4b6   : > { %v1311_v0 = vmul.f32 %v1310_v63, %v2305_v9 }
 0x4b8   : > { %v1312_v2 = vsub.f32 %v1305_v60, %v1311_v0 }
 0x4ba   : > { %v1313_v3 = vmul.f32 %v1312_v2, %v1312_v2 }
 0x4bc   : > { %v1314_v4 = vsel %vm718_vm1, %v1313_v3, 0.0 }
 0x4bd   : > { %1315 = vadd.xlane.f32.xlu1 %v1314_v4 }
 0x530   : > { %v1316_v7 = vpop.xlane.xlu1 %1315 }
 0x531   : > { %v1317_v8 = vmul.f32 0.032258064, %v1316_v7 }
 0x533   : > { %v1318_v11 = vadd.f32 1e-05, %v1317_v8 }
 0x535   : > { %1975 = vrsqrt.f32 %v1318_v11  ;;  %vm1325_vm7 = vweird.f32 %v1318_v11 }
 0x53b   : > { %v1976_v16 = vpop.eup %1975 }
 0x53c   : > { %v1320_v17 = vmul.f32 %v1976_v16, %v1318_v11  ;;  %vm1326_vm6 = vweird.f32 %v1976_v16 }
 0x53d   : > { %vm1327_vm12 = vmor %vm1325_vm7, %vm1326_vm6 }
 0x53e   : > { %v1321_v19 = vmul.f32 %v1976_v16, %v1320_v17 }
 0x540   : > { %v1322_v20 = vmul.f32 0.5, %v1321_v19 }
 0x542   : > { %v1323_v22 = vsub.f32 1.5, %v1322_v20 }
 0x544   : > { %v1324_v23 = vmul.f32 %v1976_v16, %v1323_v22 }
 0x546   : > { %v1328_v25 = vsel %vm1327_vm12, %v1976_v16, %v1324_v23 }
 0x547   : > { %v1329_v26 = vmul.f32 %v1328_v25, %v1312_v2 }
 0x549   : > { %v1333_v28 = vmul.f32 %v1951_v24, %v1329_v26 }
 0x54b   : > { %v1337_v29 = vadd.f32 %v1952_v27, %v1333_v28 }
 0x54d   : > { %v1338_v30 = vpack.c.bf16 %v1337_v29, %v1337_v29 }
 0x54f   : > { %1803 = vmatmul.msk.bf16.vlgmr.msra.gmra.mxu0 %vm718_vm1, %v1338_v30 }
 0x5cc   : > { %v1371_v34 = vpop.f32.mrf.mxu0 }
 0x5cd   : > { %v1372_v35 = vadd.f32 %v1953_v33, %v1371_v34 }
 0x5cf   : > { %v1375_v14 = vmax.f32 %v1372_v35, 0.0 }
 0x5d1   : > { %v1376_v15 = vpack.c.bf16 %v1375_v14, %v1375_v14 }
 0x5d3   : > { %1453 = vmatmul.bf16.vlgmr.msrb.gmra.mxu1 %v1376_v15 }
 0x5d4   : > { %v1373_v36 = vpop.f32.mrf.mxu0 }
 0x650   : > { %v1454_v38 = vpop.f32.mrf.mxu1 }
 0x651   : > { %v1455_v39 = vadd.f32 %v1954_v37, %v1454_v38 }
 0x653   : > { %v1458_v40 = vadd.f32 %v1455_v39, %v1305_v60 }
 0x654   : > { %1463 = sbr.rel (%p1836_p1) target bundleno = 2029 (0x7ed), region = 92 }
 0x655   : > { %1459 = vst.msk [vmem:[#allocation2] sm:$0xff] %vm718_vm1, %v1458_v40 }
 0x658   : > { %v1456_v41 = vpop.f32.mrf.mxu1 }
 0x659   : > { %v1466_v42 = vsel %vm718_vm1, %v1458_v40, 0.0  ;;  %v1873_v49 = vld [vmem:[%s2568_s24 + $0x8] sm:$0xff]  ;;  %v1872_v50 = vld [vmem:[%s2569_s30] sm:$0xff] }
 0x65a   : > { %1467 = vadd.xlane.f32.xlu0 %v1466_v42  ;;  %1526 = vmatpush.bf16.msra.mxu0 %v1873_v49  ;;  %v1977_v58 = vld [vmem:[%s2570_s14] ss:$0 sm:$0xff] }
 0x65b   : > { %v1978_v61 = vld [vmem:[%s2571_s28] ss:$0 sm:$0xff] }
 0x65c   : > { %v1979_v2 = vld [vmem:[%s2572_s2] ss:$0 sm:$0xff] }
 0x65e   : > { %1527 = vmatpush.bf16.msra.mxu0 %v1872_v50 }
 0x6cd   : > { %v1468_v43 = vpop.xlane.xlu0 %1467 }
 0x6ce   : > { %v1469_v44 = vmul.f32 %v1468_v43, %v2305_v9 }
 0x6d0   : > { %v1470_v45 = vsub.f32 %v1458_v40, %v1469_v44 }
 0x6d2   : > { %v1471_v46 = vmul.f32 %v1470_v45, %v1470_v45 }
 0x6d4   : > { %v1472_v48 = vsel %vm718_vm1, %v1471_v46, 0.0 }
 0x6d5   : > { %1473 = vadd.xlane.f32.xlu0 %v1472_v48 }
 0x748   : > { %v1474_v47 = vpop.xlane.xlu0 %1473 }
 0x749   : > { %v1475_v51 = vmul.f32 0.032258064, %v1474_v47 }
 0x74b   : > { %v1476_v52 = vadd.f32 1e-05, %v1475_v51 }
 0x74d   : > { %1980 = vrsqrt.f32 %v1476_v52  ;;  %vm1483_vm14 = vweird.f32 %v1476_v52 }
 0x753   : > { %v1981_v9 = vpop.eup %1980 }
 0x754   : > { %v1478_v53 = vmul.f32 %v1981_v9, %v1476_v52  ;;  %vm1484_vm13 = vweird.f32 %v1981_v9 }
 0x755   : > { %vm1485_vm15 = vmor %vm1483_vm14, %vm1484_vm13 }
 0x756   : > { %v1479_v54 = vmul.f32 %v1981_v9, %v1478_v53 }
 0x758   : > { %v1480_v55 = vmul.f32 0.5, %v1479_v54 }
 0x75a   : > { %v1481_v56 = vsub.f32 1.5, %v1480_v55 }
 0x75c   : > { %v1482_v57 = vmul.f32 %v1981_v9, %v1481_v56 }
 0x75e   : > { %v1486_v59 = vsel %vm1485_vm15, %v1981_v9, %v1482_v57 }
 0x75f   : > { %v1487_v60 = vmul.f32 %v1486_v59, %v1470_v45 }
 0x761   : > { %v1491_v62 = vmul.f32 %v1977_v58, %v1487_v60 }
 0x763   : > { %v1495_v63 = vadd.f32 %v1978_v61, %v1491_v62 }
 0x765   : > { %v1496_v0 = vpack.c.bf16 %v1495_v63, %v1495_v63 }
 0x767   : > { %1845 = vmatmul.msk.bf16.vlgmr.msra.gmra.mxu0 %vm718_vm1, %v1496_v0 }
 0x7e4   : > { %v1529_v3 = vpop.f32.mrf.mxu0 }
 0x7e5   : > { %v1530_v4 = vadd.f32 %v1979_v2, %v1529_v3 }
 0x7e7   : > { %1533 = vst [vmem:[%s661_s16] sm:$0xff] %v1530_v4 }
 0x7ec   : > { %v1531_v5 = vpop.f32.mrf.mxu0 }
 0x7ed PF: > { %s2573_s15 = sld [smem:[#allocation10_spill]]  ;;  %s1547_s27 = sshll.u32 %s661_s16, 4  ;;  %s1548_s27 = int_to_ptr.vmem [resolvable:$true] %s1547_s27 }
 0x7ee   : > { %s2574_s0 = sld [smem:[#allocation7_spill]] }
 0x7ef   : > { %s2576_s21 = sld [smem:[#allocation28_spill]] }
 0x7f3   : > { %s1847_s18 = sshll.u32 %s2573_s15, 3 }
 0x7f4   : > { %s2578_s13 = sand.u32 1, %s2574_s0  }
 0x7f5   : > { %s2577_s19 = smov %s2576_s21  ;;  %s1545_s24 = scalar_lea.hbm %s2576_s21, %s1847_s18 }
 0x7f6   : > { %s1549_s23 = sshll.u32 %s1545_s24, 4  ;;  %s1535_s14 = scalar_lea.sflag [#allocation4], %s2578_s13  ;;  %s1550_s23 = int_to_ptr.hbm [resolvable:$true] %s1549_s23 }
 0x7f7   : > { %s1996_s17 = sshra.s32 %s1550_s23, 4  ;;  %s2002_s22 = scalar_lea.hbm %s2577_s19, 16  ;;  %s1997_s17 = int_to_ptr.hbm [resolvable:$true] %s1996_s17 }
 0x7f8   : > { %s1998_s12 = scalar_lea.hbm %s1997_s17, 8  ;;  %p2003_p6 = scmp.lt.s32.totalorder %s1997_s17, %s2577_s19 }
 0x7f9   : > { %p1999_p2 = scmp.ne.s32.totalorder %s1997_s17, %s1998_s12  ;;  %p2004_p7 = scmp.lt.s32.totalorder %s2002_s22, %s1998_s12 }
 0x7fb   : > { %p2000_p4 = pnand %p1999_p2, %p2215_p3  ;;  %p2005_p8 = por %p2004_p7, %p2003_p6 }
 0x7fd   : > { %p2001_p5 = pneg %p2000_p4 }
 0x7ff   : > { %p2006_p10 = pnand %p2005_p8, %p2001_p5 }
 0x801   : > { %2009 = shalt.err (!%p2006_p10)
}
 0x802   : > { %1874 = dma.vmem_to_hbm [thread:$0]  (%p2215_p3), %s1548_s27, 128, %s1550_s23, %s1535_s14  }
 0x803 PF: > { %s2579_s26 = sld [smem:[#allocation13_spill]] }
 0x804   : > { %s2580_s16 = sld [smem:[#allocation6_spill]] }
 0x809   : > { %p1880_p11 = scmp.ge.s32.totalorder %s2579_s26, 2 }
 0x80a   : > { %s1561_s18 = sand.u32 1, %s2580_s16  }
 0x80b   : > { %p1877_p12 = pnand %p1880_p11, %p2225_p9  ;;  %s1562_s20 = scalar_lea.sflag [#allocation4], %s1561_s18 }
 0x80d   : > { %p1878_p13 = pneg %p1877_p12 }
 0x80f   : > { %2043 = dma.done.wait (%p1878_p13), %s1562_s20, 128  }
 0x810   : > { %2045 = vsyncadd (%p1878_p13), %s1562_s20, 4294967168  ;;  %s29_s28 = sadd.s32 1, %s2579_s26   ;;  %s2582_s21 = sld [smem:[#allocation7_spill]] }
 0x811   : > { %p26_p0 = scmp.ge.s32.totalorder %s29_s28, 6   ;;  %s2583_s22 = sld [smem:[#allocation8_spill]] }
 0x812   : > { %s2584_s23 = sld [smem:[#allocation18_spill]] }
 0x813   : > { %s2585_s24 = sld [smem:[#allocation11_spill]]  ;;  %28 = sbr.rel (!%p26_p0) target bundleno = 14 (0xe), region = 160 }
 0x814   : > { %s2586_s25 = sld [smem:[#allocation12_spill]] }
 0x815   : > { %s2587_s26 = sld [smem:[#allocation14_spill]] }
 0x816   : > { %s2588_s27 = sld [smem:[#allocation16_spill]] }
 0x818   :  { %1568 = vsyncpa [#allocation4], 1 }
 0x819   :  { %1570 = vsyncpa [#allocation4 + $0x1], 1 }

</bundles_post_ra>
